<compile_context>
chip_gen: v7x
topology: tpu7x:2x2x1
jax: 0.10.0
libtpu: 0.0.40
codegen_flags: <defaults>
</compile_context>

<pallas_src>
import functools

import jax
import jax.numpy as jnp
from jax.experimental import pallas as pl
from jax.experimental.pallas import tpu as pltpu


def _round_up(x, m):
    return ((x + m - 1) // m) * m


@functools.lru_cache(maxsize=1)
def _vmem_limit_bytes():
    """Generation-aware VMEM budget (v5e/v6e: ~100 MiB, v7x: ~48 MiB)."""
    cap = 64 * 1024 * 1024
    try:
        info = pltpu.get_tpu_info()
        cap = int(getattr(info, "vmem_capacity_bytes", cap))
    except Exception:
        pass
    return int(max(32 * 1024 * 1024,
                   min(cap - 16 * 1024 * 1024, 100 * 1024 * 1024)))


# ------------------------------ fused kernel --------------------------------


def _bottleneck_kernel(x_ref, w1_ref, b1_ref, w2_ref, b2_ref, w3_ref, b3_ref,
                       *rest, H, W, P, has_downsample, identity, compute_dtype):
    """One grid step == one image; all intermediates stay in VMEM/vregs.

    conv2 (3x3, pad=1) runs as 3 MXU matmuls with K = 3*width: y1 is written
    three times into a flat, zero-haloed VMEM scratch at lane offsets
    {0, width, 2*width}, row-shifted by the horizontal tap offset (dx-1) and
    horizontally boundary-masked at store time, so the tap for vertical
    offset dy is a single contiguous, mask-free (M, 3*width) load at row
    P + (dy-1)*W (sublane-aligned when P and W are multiples of the packing).
    """
    if has_downsample:
        wd_ref, bd_ref, o_ref, y1h_ref = rest
    else:
        o_ref, y1h_ref = rest

    M = H * W
    width = w1_ref.shape[-1]

    x = x_ref[...]                                     # (M, Cin), input dtype
    xc = x.astype(compute_dtype)

    # conv1: 1x1 + bias + ReLU (f32 accumulate & epilogue; weights pre-cast).
    y1 = jnp.dot(xc, w1_ref[...], preferred_element_type=jnp.float32)
    y1 = jnp.maximum(y1 + b1_ref[...], 0.0)            # (M, width) f32
    y1c = y1.astype(compute_dtype)

    # Horizontal boundary masks, hoisted out of the tap loop and applied once
    # at store time: the dx=0 (left-neighbor) copy must read 0 when the tap's
    # own column is W-1, the dx=2 (right-neighbor) copy when it is 0.
    col = jax.lax.broadcasted_iota(jnp.int32, (M, 1), 0) % W
    y1_left = jnp.where(col == W - 1, 0, y1c)          # feeds dx = 0 taps
    y1_right = jnp.where(col == 0, 0, y1c)             # feeds dx = 2 taps

    # Build the haloed, dx-expanded scratch.  Zero the halo rows the 3 tap
    # loads can touch, then overwrite the live rows.  Only the dx=0/dx=2
    # copies (row offsets P+1 / P-1) are sublane-unaligned; the tap loads
    # below are aligned.
    zero = jnp.zeros((P + 1, 3 * width), compute_dtype)
    y1h_ref[0:P + 1, :] = zero
    y1h_ref[P + M - 1:M + 2 * P, :] = zero
    y1h_ref[P + 1:P + 1 + M, 0:width] = y1_left
    y1h_ref[P:P + M, width:2 * width] = y1c
    y1h_ref[P - 1:P - 1 + M, 2 * width:3 * width] = y1_right

    # conv2: 3x3, padding=1, as 3 matmuls with K = 3*width (fills the 256-deep
    # MXU on v6e/v7x; K-accumulation happens inside the MXU).
    acc = jnp.zeros((M, width), jnp.float32)
    for dy in range(3):                                # static unroll
        start = P + (dy - 1) * W
        tap = y1h_ref[start:start + M, :]              # (M, 3*width), no masks
        acc = acc + jnp.dot(tap, w2_ref[dy], preferred_element_type=jnp.float32)
    y2 = jnp.maximum(acc + b2_ref[...], 0.0)           # (M, width) f32

    # conv3: 1x1.  (scale * residual) is already folded into w3/b3.
    y3 = jnp.dot(y2.astype(compute_dtype), w3_ref[...],
                 preferred_element_type=jnp.float32) + b3_ref[...]

    # downsample(x) (identity factor pre-folded) + residual add + ReLU.
    if has_downsample:
        ds = jnp.dot(xc, wd_ref[...],
                     preferred_element_type=jnp.float32) + bd_ref[...]
    else:
        ds = identity * x.astype(jnp.float32)
    o_ref[...] = jnp.maximum(y3 + ds, 0.0).astype(o_ref.dtype)


# --------------------------- parameter handling ------------------------------


def init_bottleneck_params(key, inplanes, planes, groups=1, base_width=64):
    """Kaiming-normal (relu) weights, zero biases, scale = 1 -- as in __init__.

    Layouts for loading real PyTorch weights:
      w1          = conv1.weight[:, :, 0, 0].T              (inplanes, width)
      w2[dy*3+dx] = conv2.weight[:, :, dy, dx].T            (9, width, width)
      w3          = conv3.weight[:, :, 0, 0].T              (width, 4*planes)
      wd          = downsample[1].weight[:, :, 0, 0].T      (inplanes, 4*planes)
    """
    expansion = 4
    width = int(planes * (base_width / 64.0)) * groups
    cexp = planes * expansion
    k1, k2, k3, kd = jax.random.split(key, 4)

    def kaiming(k, shape, fan_in):
        return jax.random.normal(k, shape, jnp.float32) * jnp.sqrt(2.0 / fan_in)

    params = dict(
        w1=kaiming(k1, (inplanes, width), inplanes),
        b1=jnp.zeros((1, width), jnp.float32),
        w2=kaiming(k2, (9, width, width), 9 * width),
        b2=jnp.zeros((1, width), jnp.float32),
        w3=kaiming(k3, (width, cexp), width),
        b3=jnp.zeros((1, cexp), jnp.float32),
        scale=jnp.ones((1, 1), jnp.float32),                # self._scale
    )
    if inplanes != cexp:                                    # projection downsample
        params["wd"] = kaiming(kd, (inplanes, cexp), inplanes)
        params["bd"] = jnp.zeros((1, cexp), jnp.float32)
    return params


def _fold_params(params, residual, identity, compute_dtype):
    """Fold scale*residual / identity into the 1x1 convs, pack w2 for the
    K=3*width conv2 formulation, and pre-cast weights to compute_dtype
    (biases stay f32: they are added to f32 accumulators)."""
    s = params["scale"].reshape(()) * residual
    width = params["w1"].shape[1]
    folded = dict(
        w1=params["w1"].astype(compute_dtype),
        b1=params["b1"].astype(jnp.float32),
        # (9, width, width) indexed dy*3+dx -> (3, 3*width, width): block dy's
        # rows are the 3 dx taps stacked along the input-channel axis.
        w2=params["w2"].reshape(3, 3 * width, width).astype(compute_dtype),
        b2=params["b2"].astype(jnp.float32),
        w3=(params["w3"] * s).astype(compute_dtype),
        b3=(params["b3"] * s).astype(jnp.float32),
    )
    if "wd" in params:
        folded["wd"] = (params["wd"] * identity).astype(compute_dtype)
        folded["bd"] = (params["bd"] * identity).astype(jnp.float32)
    return folded


# -------------------------------- forward -----------------------------------


def bottleneck_forward_nhwc(x_nhwc, params, *, block_idx, max_block, stride=1,
                            compute_dtype=jnp.bfloat16, out_dtype=None,
                            debug=False):
    """Fused Bottleneck forward on an NHWC input; returns NHWC."""
    if stride != 1:
        raise NotImplementedError(
            "TODO(synk): stride>1 (AvgPool2d downsample) not implemented")
    residual = float(max_block) ** (-0.5)
    identity = float(block_idx) ** 0.5 / float(block_idx + 1) ** 0.5

    n, h, w, cin = x_nhwc.shape
    m = h * w
    if m % 8 != 0 and n != 1:
        raise NotImplementedError(
            "TODO(synk): H*W must be a multiple of 8 (sublane) when batch > 1")
    x2d = x_nhwc.reshape(n * m, cin)            # keep caller's dtype (bf16 ok)

    p = _fold_params(params, residual, identity, compute_dtype)
    width = params["w1"].shape[1]
    cexp = params["w3"].shape[1]
    has_ds = "wd" in p
    if not has_ds and cin != cexp:
        raise ValueError("identity downsample needs inplanes == 4*planes")

    pad = max(16, _round_up(w, 16))     # halo rows, 16-aligned for bf16 packing

    kernel = functools.partial(
        _bottleneck_kernel, H=h, W=w, P=pad, has_downsample=has_ds,
        identity=identity, compute_dtype=compute_dtype)

    operands = [x2d, p["w1"], p["b1"], p["w2"], p["b2"], p["w3"], p["b3"]]
    in_specs = [
        pl.BlockSpec((m, cin), lambda i: (i, 0)),           # one image per step
        pl.BlockSpec((cin, width), lambda i: (0, 0)),
        pl.BlockSpec((1, width), lambda i: (0, 0)),
        pl.BlockSpec((3, 3 * width, width), lambda i: (0, 0, 0)),
        pl.BlockSpec((1, width), lambda i: (0, 0)),
        pl.BlockSpec((width, cexp), lambda i: (0, 0)),
        pl.BlockSpec((1, cexp), lambda i: (0, 0)),
    ]
    if has_ds:
        operands += [p["wd"], p["bd"]]
        in_specs += [pl.BlockSpec((cin, cexp), lambda i: (0, 0)),
                     pl.BlockSpec((1, cexp), lambda i: (0, 0))]

    out_dt = x_nhwc.dtype if out_dtype is None else out_dtype

    out2d = pl.pallas_call(
        kernel,
        out_shape=jax.ShapeDtypeStruct((n * m, cexp), out_dt),
        grid=(n,),
        in_specs=in_specs,
        out_specs=pl.BlockSpec((m, cexp), lambda i: (i, 0)),
        scratch_shapes=[pltpu.VMEM((m + 2 * pad, 3 * width), compute_dtype)],
        compiler_params=pltpu.CompilerParams(
            dimension_semantics=("parallel",),              # 2 TCs on v7x
            vmem_limit_bytes=_vmem_limit_bytes()),
    )(*operands)

    out = out2d.reshape(n, h, w, cexp)
    if debug:
        # Mirrors the module's print(nonzero/numel); gated because it costs an
        # extra pass over the output.
        frac = jnp.count_nonzero(out) / out.size
        jax.debug.print("nonzero fraction = {}", frac)
    return out


def bottleneck_forward(x_nchw, params, *, block_idx, max_block, stride=1,
                       compute_dtype=jnp.bfloat16, out_dtype=None, debug=False):
    """NCHW wrapper matching the PyTorch module interface.  The NCHW<->NHWC
    transposes are boundary glue; use bottleneck_forward_nhwc inside a stack."""
    x = jnp.transpose(x_nchw, (0, 2, 3, 1))
    out = bottleneck_forward_nhwc(
        x, params, block_idx=block_idx, max_block=max_block, stride=stride,
        compute_dtype=compute_dtype, out_dtype=out_dtype, debug=debug)
    return jnp.transpose(out, (0, 3, 1, 2))


# --------------------------- pure-JAX reference ------------------------------


def bottleneck_reference(x_nchw, params, *, block_idx, max_block):
    """Non-Pallas f32 reference (only used for the self-check in __main__)."""
    residual = float(max_block) ** (-0.5)
    identity = float(block_idx) ** 0.5 / float(block_idx + 1) ** 0.5
    hp = jax.lax.Precision.HIGHEST
    x = jnp.transpose(x_nchw, (0, 2, 3, 1)).astype(jnp.float32)
    y1 = jax.nn.relu(jnp.einsum("nhwc,cd->nhwd", x, params["w1"], precision=hp)
                     + params["b1"][0])
    w2 = params["w2"].reshape(3, 3, params["w2"].shape[1], params["w2"].shape[2])
    y2 = jax.lax.conv_general_dilated(
        y1, w2, window_strides=(1, 1), padding=((1, 1), (1, 1)),
        dimension_numbers=("NHWC", "HWIO", "NHWC"), precision=hp)
    y2 = jax.nn.relu(y2 + params["b2"][0])
    y3 = (jnp.einsum("nhwc,cd->nhwd", y2, params["w3"], precision=hp)
          + params["b3"][0])
    if "wd" in params:
        ds = (jnp.einsum("nhwc,cd->nhwd", x, params["wd"], precision=hp)
              + params["bd"][0])
    else:
        ds = x
    out = jax.nn.relu(y3 * (params["scale"][0, 0] * residual) + identity * ds)
    return jnp.transpose(out, (0, 3, 1, 2))


# ---------------------------------- main -------------------------------------


if __name__ == "__main__":
    key = jax.random.PRNGKey(0)
    kx, kp, kx2, kp2 = jax.random.split(key, 4)

    # Config 1: projection downsample (inplanes != 4*planes).
    N, inplanes, H, W = 2, 64, 16, 16
    planes, block_idx, max_block = 32, 1, 4
    x = jax.random.normal(kx, (N, inplanes, H, W), jnp.float32)
    params = init_bottleneck_params(kp, inplanes, planes)
    ref = bottleneck_reference(x, params, block_idx=block_idx, max_block=max_block)

    # (a) f32 compute path: tight structural check (tap offsets, masks, folds).
    fwd_f32 = jax.jit(functools.partial(
        bottleneck_forward, block_idx=block_idx, max_block=max_block,
        compute_dtype=jnp.float32))
    out_f32 = fwd_f32(x, params)
    jax.block_until_ready(out_f32)
    assert out_f32.shape == (N, planes * 4, H, W) and out_f32.dtype == jnp.float32
    err = float(jnp.max(jnp.abs(out_f32 - ref)))
    assert err < 5e-2, f"f32 path mismatch vs reference (downsample): {err}"

    # (b) default bf16-MXU path: looser tolerance (bf16 operand rounding).
    fwd_bf16 = jax.jit(functools.partial(
        bottleneck_forward, block_idx=block_idx, max_block=max_block))
    out_bf16 = fwd_bf16(x, params)
    jax.block_until_ready(out_bf16)
    err = float(jnp.max(jnp.abs(out_bf16 - ref)))
    assert err < 2e-1, f"bf16 path mismatch vs reference (downsample): {err}"

    # Config 2: identity-downsample branch (inplanes == 4*planes).
    inplanes2, planes2 = 128, 32
    x2 = jax.random.normal(kx2, (N, inplanes2, H, W), jnp.float32)
    params2 = init_bottleneck_params(kp2, inplanes2, planes2)
    ref2 = bottleneck_reference(x2, params2, block_idx=2, max_block=max_block)

    out2_f32 = bottleneck_forward(x2, params2, block_idx=2, max_block=max_block,
                                  compute_dtype=jnp.float32)
    jax.block_until_ready(out2_f32)
    assert out2_f32.shape == (N, planes2 * 4, H, W)
    err2 = float(jnp.max(jnp.abs(out2_f32 - ref2)))
    assert err2 < 5e-2, f"f32 path mismatch vs reference (identity): {err2}"

    out2_bf16 = bottleneck_forward(x2, params2, block_idx=2, max_block=max_block)
    jax.block_until_ready(out2_bf16)
    err2 = float(jnp.max(jnp.abs(out2_bf16 - ref2)))
    assert err2 < 2e-1, f"bf16 path mismatch vs reference (identity): {err2}"

    print("KERNEL_OK")
</pallas_src>

<mosaic_0001>
module attributes {stable_mosaic.version = 11 : i64} {
  func.func @_bottleneck_kernel(%arg0: i32, %arg1: memref<256x64xf32, #tpu.memory_space<vmem>>, %arg2: memref<64x32xf32, #tpu.memory_space<vmem>>, %arg3: memref<1x32xf32, #tpu.memory_space<vmem>>, %arg4: memref<3x96x32xf32, #tpu.memory_space<vmem>>, %arg5: memref<1x32xf32, #tpu.memory_space<vmem>>, %arg6: memref<32x128xf32, #tpu.memory_space<vmem>>, %arg7: memref<1x128xf32, #tpu.memory_space<vmem>>, %arg8: memref<64x128xf32, #tpu.memory_space<vmem>>, %arg9: memref<1x128xf32, #tpu.memory_space<vmem>>, %arg10: memref<256x128xf32, #tpu.memory_space<vmem>>, %arg11: memref<288x96xf32, #tpu.memory_space<vmem>>) attributes {dimension_semantics = [#tpu.dimension_semantics<parallel>], iteration_bounds = array<i64: 2>, scalar_prefetch = 0 : i64, scratch_operands = 1 : i64, tpu.core_type = #tpu.core_type<tc>, window_params = [{transform_indices = @transform_0, window_bounds = array<i64: 256, 64>}, {pipeline_mode = #tpu.pipeline_mode<synchronous>, transform_indices = @transform_1, window_bounds = array<i64: 64, 32>}, {pipeline_mode = #tpu.pipeline_mode<synchronous>, transform_indices = @transform_2, window_bounds = array<i64: 1, 32>}, {pipeline_mode = #tpu.pipeline_mode<synchronous>, transform_indices = @transform_3, window_bounds = array<i64: 3, 96, 32>}, {pipeline_mode = #tpu.pipeline_mode<synchronous>, transform_indices = @transform_4, window_bounds = array<i64: 1, 32>}, {pipeline_mode = #tpu.pipeline_mode<synchronous>, transform_indices = @transform_5, window_bounds = array<i64: 32, 128>}, {pipeline_mode = #tpu.pipeline_mode<synchronous>, transform_indices = @transform_6, window_bounds = array<i64: 1, 128>}, {pipeline_mode = #tpu.pipeline_mode<synchronous>, transform_indices = @transform_7, window_bounds = array<i64: 64, 128>}, {pipeline_mode = #tpu.pipeline_mode<synchronous>, transform_indices = @transform_8, window_bounds = array<i64: 1, 128>}, {transform_indices = @transform_9, window_bounds = array<i64: 256, 128>}]} {
    %c0 = arith.constant 0 : index
    %c0_0 = arith.constant 0 : index
    %0 = vector.load %arg1[%c0, %c0_0] : memref<256x64xf32, #tpu.memory_space<vmem>>, vector<256x64xf32>
    %c0_1 = arith.constant 0 : index
    %c0_2 = arith.constant 0 : index
    %1 = vector.load %arg2[%c0_1, %c0_2] : memref<64x32xf32, #tpu.memory_space<vmem>>, vector<64x32xf32>
    %cst = arith.constant dense<0.000000e+00> : vector<256x32xf32>
    %2 = tpu.matmul %0, %1, %cst {dimension_numbers = #tpu.dot_dimension_numbers<[1], [0], [0], [1], [0, 0, 1, 1], [], []>} : vector<256x64xf32>, vector<64x32xf32>, vector<256x32xf32> -> vector<256x32xf32>
    %c0_3 = arith.constant 0 : index
    %c0_4 = arith.constant 0 : index
    %3 = vector.load %arg3[%c0_3, %c0_4] : memref<1x32xf32, #tpu.memory_space<vmem>>, vector<1x32xf32>
    %4 = vector.broadcast %3 : vector<1x32xf32> to vector<256x32xf32>
    %5 = arith.addf %2, %4 : vector<256x32xf32>
    %cst_5 = arith.constant 0.000000e+00 : f32
    %6 = vector.broadcast %cst_5 : f32 to vector<256x32xf32>
    %7 = arith.maximumf %5, %6 : vector<256x32xf32>
    %8 = tpu.iota {dimensions = array<i32: 0>} : vector<256x1xi32>
    %c16_i32 = arith.constant 16 : i32
    %c0_i32 = arith.constant 0 : i32
    %9 = arith.cmpi eq, %c16_i32, %c0_i32 : i32
    %c1_i32 = arith.constant 1 : i32
    %10 = arith.select %9, %c1_i32, %c16_i32 : i32
    %11 = vector.broadcast %10 : i32 to vector<256x1xi32>
    %12 = arith.remsi %8, %11 : vector<256x1xi32>
    %c0_i32_6 = arith.constant 0 : i32
    %13 = vector.broadcast %c0_i32_6 : i32 to vector<256x1xi32>
    %14 = arith.cmpi ne, %12, %13 : vector<256x1xi32>
    %c0_i32_7 = arith.constant 0 : i32
    %15 = vector.broadcast %c0_i32_7 : i32 to vector<256x1xi32>
    %16 = arith.cmpi slt, %12, %15 : vector<256x1xi32>
    %c0_i32_8 = arith.constant 0 : i32
    %17 = arith.cmpi slt, %10, %c0_i32_8 : i32
    %18 = vector.broadcast %17 : i1 to vector<256x1xi1>
    %19 = vector.broadcast %18 : vector<256x1xi1> to vector<256x1xi1>
    %20 = arith.xori %16, %19 : vector<256x1xi1>
    %21 = arith.andi %20, %14 : vector<256x1xi1>
    %22 = vector.broadcast %10 : i32 to vector<256x1xi32>
    %23 = arith.addi %12, %22 : vector<256x1xi32>
    %24 = arith.select %21, %23, %12 : vector<256x1xi1>, vector<256x1xi32>
    %c15_i32 = arith.constant 15 : i32
    %25 = vector.broadcast %c15_i32 : i32 to vector<256x1xi32>
    %26 = arith.cmpi eq, %24, %25 : vector<256x1xi32>
    %c0_i32_9 = arith.constant 0 : i32
    %27 = arith.sitofp %c0_i32_9 : i32 to f32
    %28 = vector.shape_cast %26 : vector<256x1xi1> to vector<256x1xi1>
    %29 = vector.broadcast %28 : vector<256x1xi1> to vector<256x32xi1>
    %30 = vector.broadcast %27 : f32 to vector<256x32xf32>
    %31 = arith.select %29, %30, %7 : vector<256x32xi1>, vector<256x32xf32>
    %c0_i32_10 = arith.constant 0 : i32
    %32 = vector.broadcast %c0_i32_10 : i32 to vector<256x1xi32>
    %33 = arith.cmpi eq, %24, %32 : vector<256x1xi32>
    %c0_i32_11 = arith.constant 0 : i32
    %34 = arith.sitofp %c0_i32_11 : i32 to f32
    %35 = vector.shape_cast %33 : vector<256x1xi1> to vector<256x1xi1>
    %36 = vector.broadcast %35 : vector<256x1xi1> to vector<256x32xi1>
    %37 = vector.broadcast %34 : f32 to vector<256x32xf32>
    %38 = arith.select %36, %37, %7 : vector<256x32xi1>, vector<256x32xf32>
    %cst_12 = arith.constant 0.000000e+00 : f32
    %39 = vector.broadcast %cst_12 : f32 to vector<17x96xf32>
    %c0_13 = arith.constant 0 : index
    %c0_14 = arith.constant 0 : index
    %40 = vector.load %arg11[%c0_13, %c0_14] : memref<288x96xf32, #tpu.memory_space<vmem>>, vector<17x96xf32>
    tpu.vector_store %arg11[%c0_13, %c0_14], %39 {strides = array<i32>} : memref<288x96xf32, #tpu.memory_space<vmem>>, vector<17x96xf32>,
    %c271 = arith.constant 271 : index
    %c0_15 = arith.constant 0 : index
    %41 = vector.load %arg11[%c271, %c0_15] : memref<288x96xf32, #tpu.memory_space<vmem>>, vector<17x96xf32>
    tpu.vector_store %arg11[%c271, %c0_15], %39 {strides = array<i32>} : memref<288x96xf32, #tpu.memory_space<vmem>>, vector<17x96xf32>,
    %c17 = arith.constant 17 : index
    %c0_16 = arith.constant 0 : index
    %42 = vector.load %arg11[%c17, %c0_16] : memref<288x96xf32, #tpu.memory_space<vmem>>, vector<256x32xf32>
    tpu.vector_store %arg11[%c17, %c0_16], %31 {strides = array<i32>} : memref<288x96xf32, #tpu.memory_space<vmem>>, vector<256x32xf32>,
    %c16 = arith.constant 16 : index
    %c32 = arith.constant 32 : index
    %43 = vector.load %arg11[%c16, %c32] : memref<288x96xf32, #tpu.memory_space<vmem>>, vector<256x32xf32>
    tpu.vector_store %arg11[%c16, %c32], %7 {strides = array<i32>} : memref<288x96xf32, #tpu.memory_space<vmem>>, vector<256x32xf32>,
    %c15 = arith.constant 15 : index
    %c64 = arith.constant 64 : index
    %44 = vector.load %arg11[%c15, %c64] : memref<288x96xf32, #tpu.memory_space<vmem>>, vector<256x32xf32>
    tpu.vector_store %arg11[%c15, %c64], %38 {strides = array<i32>} : memref<288x96xf32, #tpu.memory_space<vmem>>, vector<256x32xf32>,
    %cst_17 = arith.constant 0.000000e+00 : f32
    %45 = vector.broadcast %cst_17 : f32 to vector<256x32xf32>
    %c0_18 = arith.constant 0 : index
    %c0_19 = arith.constant 0 : index
    %46 = vector.load %arg11[%c0_18, %c0_19] : memref<288x96xf32, #tpu.memory_space<vmem>>, vector<256x96xf32>
    %c0_20 = arith.constant 0 : index
    %c0_21 = arith.constant 0 : index
    %c0_22 = arith.constant 0 : index
    %47 = vector.load %arg4[%c0_20, %c0_21, %c0_22] : memref<3x96x32xf32, #tpu.memory_space<vmem>>, vector<1x96x32xf32>
    %48 = vector.shape_cast %47 : vector<1x96x32xf32> to vector<96x32xf32>
    %cst_23 = arith.constant dense<0.000000e+00> : vector<256x32xf32>
    %49 = tpu.matmul %46, %48, %cst_23 {dimension_numbers = #tpu.dot_dimension_numbers<[1], [0], [0], [1], [0, 0, 1, 1], [], []>} : vector<256x96xf32>, vector<96x32xf32>, vector<256x32xf32> -> vector<256x32xf32>
    %50 = arith.addf %45, %49 : vector<256x32xf32>
    %c16_24 = arith.constant 16 : index
    %c0_25 = arith.constant 0 : index
    %51 = vector.load %arg11[%c16_24, %c0_25] : memref<288x96xf32, #tpu.memory_space<vmem>>, vector<256x96xf32>
    %c1 = arith.constant 1 : index
    %c0_26 = arith.constant 0 : index
    %c0_27 = arith.constant 0 : index
    %52 = vector.load %arg4[%c1, %c0_26, %c0_27] : memref<3x96x32xf32, #tpu.memory_space<vmem>>, vector<1x96x32xf32>
    %53 = vector.shape_cast %52 : vector<1x96x32xf32> to vector<96x32xf32>
    %cst_28 = arith.constant dense<0.000000e+00> : vector<256x32xf32>
    %54 = tpu.matmul %51, %53, %cst_28 {dimension_numbers = #tpu.dot_dimension_numbers<[1], [0], [0], [1], [0, 0, 1, 1], [], []>} : vector<256x96xf32>, vector<96x32xf32>, vector<256x32xf32> -> vector<256x32xf32>
    %55 = arith.addf %50, %54 : vector<256x32xf32>
    %c32_29 = arith.constant 32 : index
    %c0_30 = arith.constant 0 : index
    %56 = vector.load %arg11[%c32_29, %c0_30] : memref<288x96xf32, #tpu.memory_space<vmem>>, vector<256x96xf32>
    %c2 = arith.constant 2 : index
    %c0_31 = arith.constant 0 : index
    %c0_32 = arith.constant 0 : index
    %57 = vector.load %arg4[%c2, %c0_31, %c0_32] : memref<3x96x32xf32, #tpu.memory_space<vmem>>, vector<1x96x32xf32>
    %58 = vector.shape_cast %57 : vector<1x96x32xf32> to vector<96x32xf32>
    %cst_33 = arith.constant dense<0.000000e+00> : vector<256x32xf32>
    %59 = tpu.matmul %56, %58, %cst_33 {dimension_numbers = #tpu.dot_dimension_numbers<[1], [0], [0], [1], [0, 0, 1, 1], [], []>} : vector<256x96xf32>, vector<96x32xf32>, vector<256x32xf32> -> vector<256x32xf32>
    %60 = arith.addf %55, %59 : vector<256x32xf32>
    %c0_34 = arith.constant 0 : index
    %c0_35 = arith.constant 0 : index
    %61 = vector.load %arg5[%c0_34, %c0_35] : memref<1x32xf32, #tpu.memory_space<vmem>>, vector<1x32xf32>
    %62 = vector.broadcast %61 : vector<1x32xf32> to vector<256x32xf32>
    %63 = arith.addf %60, %62 : vector<256x32xf32>
    %cst_36 = arith.constant 0.000000e+00 : f32
    %64 = vector.broadcast %cst_36 : f32 to vector<256x32xf32>
    %65 = arith.maximumf %63, %64 : vector<256x32xf32>
    %c0_37 = arith.constant 0 : index
    %c0_38 = arith.constant 0 : index
    %66 = vector.load %arg6[%c0_37, %c0_38] : memref<32x128xf32, #tpu.memory_space<vmem>>, vector<32x128xf32>
    %cst_39 = arith.constant dense<0.000000e+00> : vector<256x128xf32>
    %67 = tpu.matmul %65, %66, %cst_39 {dimension_numbers = #tpu.dot_dimension_numbers<[1], [0], [0], [1], [0, 0, 1, 1], [], []>} : vector<256x32xf32>, vector<32x128xf32>, vector<256x128xf32> -> vector<256x128xf32>
    %c0_40 = arith.constant 0 : index
    %c0_41 = arith.constant 0 : index
    %68 = vector.load %arg7[%c0_40, %c0_41] : memref<1x128xf32, #tpu.memory_space<vmem>>, vector<1x128xf32>
    %69 = vector.broadcast %68 : vector<1x128xf32> to vector<256x128xf32>
    %70 = arith.addf %67, %69 : vector<256x128xf32>
    %c0_42 = arith.constant 0 : index
    %c0_43 = arith.constant 0 : index
    %71 = vector.load %arg8[%c0_42, %c0_43] : memref<64x128xf32, #tpu.memory_space<vmem>>, vector<64x128xf32>
    %cst_44 = arith.constant dense<0.000000e+00> : vector<256x128xf32>
    %72 = tpu.matmul %0, %71, %cst_44 {dimension_numbers = #tpu.dot_dimension_numbers<[1], [0], [0], [1], [0, 0, 1, 1], [], []>} : vector<256x64xf32>, vector<64x128xf32>, vector<256x128xf32> -> vector<256x128xf32>
    %c0_45 = arith.constant 0 : index
    %c0_46 = arith.constant 0 : index
    %73 = vector.load %arg9[%c0_45, %c0_46] : memref<1x128xf32, #tpu.memory_space<vmem>>, vector<1x128xf32>
    %74 = vector.broadcast %73 : vector<1x128xf32> to vector<256x128xf32>
    %75 = arith.addf %72, %74 : vector<256x128xf32>
    %76 = arith.addf %70, %75 : vector<256x128xf32>
    %cst_47 = arith.constant 0.000000e+00 : f32
    %77 = vector.broadcast %cst_47 : f32 to vector<256x128xf32>
    %78 = arith.maximumf %76, %77 : vector<256x128xf32>
    %c0_48 = arith.constant 0 : index
    %c0_49 = arith.constant 0 : index
    %79 = vector.load %arg10[%c0_48, %c0_49] : memref<256x128xf32, #tpu.memory_space<vmem>>, vector<256x128xf32>
    tpu.vector_store %arg10[%c0_48, %c0_49], %78 {strides = array<i32>} : memref<256x128xf32, #tpu.memory_space<vmem>>, vector<256x128xf32>,
    return
  }
  func.func @transform_0(%arg0: i32) -> (i32, i32) {
    %c0_i32 = arith.constant 0 : i32
    %c0_i32_0 = arith.constant 0 : i32
    return %arg0, %c0_i32 : i32, i32
  }
  func.func @transform_1(%arg0: i32) -> (i32, i32) {
    %c0_i32 = arith.constant 0 : i32
    %c0_i32_0 = arith.constant 0 : i32
    %c0_i32_1 = arith.constant 0 : i32
    return %c0_i32, %c0_i32_0 : i32, i32
  }
  func.func @transform_2(%arg0: i32) -> (i32, i32) {
    %c0_i32 = arith.constant 0 : i32
    %c0_i32_0 = arith.constant 0 : i32
    %c0_i32_1 = arith.constant 0 : i32
    return %c0_i32, %c0_i32_0 : i32, i32
  }
  func.func @transform_3(%arg0: i32) -> (i32, i32, i32) {
    %c0_i32 = arith.constant 0 : i32
    %c0_i32_0 = arith.constant 0 : i32
    %c0_i32_1 = arith.constant 0 : i32
    %c0_i32_2 = arith.constant 0 : i32
    return %c0_i32, %c0_i32_0, %c0_i32_1 : i32, i32, i32
  }
  func.func @transform_4(%arg0: i32) -> (i32, i32) {
    %c0_i32 = arith.constant 0 : i32
    %c0_i32_0 = arith.constant 0 : i32
    %c0_i32_1 = arith.constant 0 : i32
    return %c0_i32, %c0_i32_0 : i32, i32
  }
  func.func @transform_5(%arg0: i32) -> (i32, i32) {
    %c0_i32 = arith.constant 0 : i32
    %c0_i32_0 = arith.constant 0 : i32
    %c0_i32_1 = arith.constant 0 : i32
    return %c0_i32, %c0_i32_0 : i32, i32
  }
  func.func @transform_6(%arg0: i32) -> (i32, i32) {
    %c0_i32 = arith.constant 0 : i32
    %c0_i32_0 = arith.constant 0 : i32
    %c0_i32_1 = arith.constant 0 : i32
    return %c0_i32, %c0_i32_0 : i32, i32
  }
  func.func @transform_7(%arg0: i32) -> (i32, i32) {
    %c0_i32 = arith.constant 0 : i32
    %c0_i32_0 = arith.constant 0 : i32
    %c0_i32_1 = arith.constant 0 : i32
    return %c0_i32, %c0_i32_0 : i32, i32
  }
  func.func @transform_8(%arg0: i32) -> (i32, i32) {
    %c0_i32 = arith.constant 0 : i32
    %c0_i32_0 = arith.constant 0 : i32
    %c0_i32_1 = arith.constant 0 : i32
    return %c0_i32, %c0_i32_0 : i32, i32
  }
  func.func @transform_9(%arg0: i32) -> (i32, i32) {
    %c0_i32 = arith.constant 0 : i32
    %c0_i32_0 = arith.constant 0 : i32
    return %arg0, %c0_i32 : i32, i32
  }
}

</mosaic_0001>

<bundles_post_ra>
// kernel: bottleneck_forward.1
= control target key start
LH: loop header
LB: loop body
LE: loop exit
PB: predicated region body
PF: predicated region fallthrough
CT: control target
= control target key end

     0   :  { %14 = vsyncpa [#allocation4], 0  ;;  %s6356_s0 = inlined_call_operand.hbm [shape: f32[512,64], index: 0, kind: input, shape index: {}]   ;;  %s6357_s1 = inlined_call_operand.vmem [shape: f32[64,32], index: 1, kind: input, shape index: {}]   ;;  %s6358_s2 = inlined_call_operand.vmem [shape: f32[1,32], index: 2, kind: input, shape index: {}]   ;;  %s6359_s3 = inlined_call_operand.vmem [shape: f32[3,96,32], index: 3, kind: input, shape index: {}]   ;;  %s6360_s4 = inlined_call_operand.vmem [shape: f32[1,32], index: 4, kind: input, shape index: {}]   ;;  %s6361_s5 = inlined_call_operand.vmem [shape: f32[32,128], index: 5, kind: input, shape index: {}]   ;;  %s6362_s6 = inlined_call_operand.vmem [shape: f32[1,128], index: 6, kind: input, shape index: {}]   ;;  %s6363_s7 = inlined_call_operand.vmem [shape: f32[64,128], index: 7, kind: input, shape index: {}]   ;;  %s6364_s8 = inlined_call_operand.vmem [shape: f32[1,128], index: 8, kind: input, shape index: {}]   ;;  %s6365_s9 = inlined_call_operand.hbm [shape: f32[512,128], index: 9, kind: output, shape index: {}]  }
   0x1   :  { %16 = vsyncpa [#allocation4 + $0x1], 0 }
   0x2   :  { %17 = vsyncpa [#allocation5], 0 }
   0x3   :  { %19 = vsyncpa [#allocation5 + $0x1], 0  ;;  %s5023_s30 = smov 0   ;;  %s5025_s10 = smov 0  }
   0x4   :  { %s5027_s11 = smov 0   ;;  %s5029_s12 = smov 0  }
   0x5 LB: > { %s5044_s13 = sadd.s32 4294967295, %s4962_s12   ;;  %s3625_s14 = sadd.s32 4294967294, %s4962_s12   ;;  %s4962_s12 = sphi %s5029_s12, %s6414_s12   ;;  %s4958_s11 = sphi %s5027_s11, %s6413_s11   ;;  %s4954_s10 = sphi %s5025_s10, %s6412_s10   ;;  %s4950_s30 = sphi %s5023_s30, %s6411_s30  }
   0x6   : > { %s5048_s15 = sadd.s32 1, %s4962_s12   ;;  %s32_s16 = sadd.s32 1, %s4958_s11 }
   0x7   : > { %s29_s17 = ssub.s32 %s4962_s12, %s5048_s15  ;;  %p39_p0 = scmp.ne.s32.totalorder %s4958_s11, %s4954_s10 }
   0x8   : > { %p30_p1 = scmp.eq.s32.totalorder %s29_s17, 0  ;;  %p40_p2 = scmp.eq.s32.totalorder %s4962_s12, 0 }
   0x9   : > { %p45_p3 = scmp.ne.s32.totalorder %s4954_s10, %s4950_s30  ;;  %p46_p4 = scmp.eq.s32.totalorder %s5044_s13, 0 }
   0xa   : > { %s5060_s18 = scalar_select %p30_p1, %s4958_s11, %s32_s16  }
   0xb   : > { %p5062_p5 = por %p40_p2, %p39_p0  ;;  %p5066_p6 = por %p46_p4, %p45_p3 }
   0xc   : > { %p237_p7 = scmp.eq.s32.totalorder %s5044_s13, 1  ;;  %p243_p8 = scmp.eq.s32.totalorder %s3625_s14, 1 }
   0xd   : > { %p4793_p10 = scmp.lt.s32.totalorder %s4962_s12, 2  ;;  %s287_s23 = sand.u32 1, %s4958_s11  }
   0xe   : > { %p5073_p11 = por %p237_p7, %p39_p0  ;;  %p5077_p12 = por %p243_p8, %p45_p3 }
   0xf   : > { %s3859_s24 = sshll.u32 %s4962_s12, 12  ;;  %s3628_s25 = sshll.u32 %s287_s23, 8 }
  0x10   : > { %s6370_s21 = scalar_select %p5073_p11, 1, 0 }
  0x11   : > { %s6371_s22 = scalar_select %p5077_p12, 1, 0 }
  0x12   : > { %s5086_s28 = scalar_lea.hbm %s6356_s0, %s3859_s24  ;;  %s291_s29 = scalar_lea.vmem [#allocation3], %s3628_s25 }
  0x13   : > { %s298_s14 = sshll.u32 %s291_s29, 4  ;;  %p5090_p13 = pnand %p4793_p10, %p5062_p5  ;;  %s5094_s14 = int_to_ptr.vmem [resolvable:$true] %s298_s14 }
  0x14   : > { %s5096_s17 = scalar_lea.sflag [#allocation4], %s287_s23  ;;  %s4866_s26 = scalar_lea.hbm %s5086_s28, 4096 }
  0x15   : > { %p4867_p0 = scmp.ne.s32.totalorder %s5086_s28, %s4866_s26  ;;  %p4868_p1 = pneg %p5090_p13 }
  0x16   : > { %s4871_s25 = scalar_lea.hbm %s6356_s0, 8192  ;;  %p4872_p4 = scmp.lt.u32.totalorder %s5086_s28, %s6356_s0 }
  0x17   : > { %p4869_p2 = pnand %p4868_p1, %p4867_p0  ;;  %p4873_p5 = scmp.lt.u32.totalorder %s4871_s25, %s4866_s26 }
  0x18   : > { %p4875_p8 = scmp.lt.u32.totalorder %s4866_s26, %s5086_s28 }
  0x19   : > { %p4870_p3 = pneg %p4869_p2  ;;  %p4874_p7 = por %p4873_p5, %p4872_p4 }
  0x1b   : > { %p4876_p10 = por %p4875_p8, %p4874_p7 }
  0x1d   : > { %p4877_p9 = pnand %p4876_p10, %p4870_p3 }
  0x1f   : > { %4880 = shalt.err (!%p4877_p9)
}
  0x20   : > { %s4881_s23 = scalar_lea.vmem %s5094_s14, 4096  ;;  %s4964_s24 = smov [#allocation3]  }
  0x21   : > { %p4882_p0 = scmp.ne.s32.totalorder %s5094_s14, %s4881_s23  ;;  %s4886_s19 = sshll.u32 %s4964_s24, 4  ;;  %s4887_s19 = int_to_ptr.vmem [resolvable:$false] %s4886_s19 }
  0x22   : > { %s4888_s27 = scalar_lea.vmem %s4887_s19, 8192  ;;  %p4889_p11 = scmp.lt.s32.totalorder %s5094_s14, %s4887_s19 }
  0x23   : > { %p4884_p2 = pnand %p4882_p0, %p4868_p1  ;;  %p4890_p4 = scmp.lt.s32.totalorder %s4888_s27, %s4881_s23 }
  0x25   : > { %p4885_p12 = pneg %p4884_p2  ;;  %p4891_p5 = por %p4890_p4, %p4889_p11 }
  0x27   : > { %p4892_p7 = pnand %p4891_p5, %p4885_p12 }
  0x29   : > { %4895 = shalt.err (!%p4892_p7)
}
  0x2a   : > { %s4965_s26 = smov 128   ;;  %s4966_s25 = smov 8  }
  0x2b   : > { %4788 = dma.hbm_to_vmem [thread:$0]  (!%p5090_p13), %s5086_s28, 4096, %s5094_s14, %s5096_s17, %s4965_s26, %s4965_s26, %s4966_s25  }
  0x2c   : > { %p3631_p9 = scmp.ge.s32.totalorder %s4962_s12, 1  ;;  %p306_p1 = scmp.lt.s32.totalorder %s4962_s12, 3 }
  0x2e   : > { %p307_p3 = pnand %p3631_p9, %p306_p1 }
  0x2f   : > { %s5127_s29 = sand.u32 (!%p307_p3), 1, %s4954_s10  }
  0x30   : > { %310 = sbr.rel (%p307_p3) target bundleno = 1183 (0x49f), region = 56  ;;  %s6367_s23 = sshll.u32 (!%p307_p3), %s5127_s29, 8 }
  0x31   : > { %s313_s24 = scalar_lea.sflag (!%p307_p3), [#allocation4], %s5127_s29  ;;  %s5133_s19 = scalar_lea.vmem (!%p307_p3), [#allocation3], %s6367_s23 }
  0x37   : > { %4941 = dma.done.wait (%p5066_p6), %s313_s24, 4096  }
  0x38   : > { %4943 = vsyncadd (%p5066_p6), %s313_s24, 4294963200  ;;  %v385_v0 = vld [vmem:[%s6357_s1] sm:$0xff]  ;;  %v386_v1 = vld [vmem:[%s6357_s1 + $0x8] sm:$0xff]  ;;  %vm400_vm0 = vcmask 523264   ;;  %v754_v47 = vlaneseq  ;;  %vm1427_vm1 = vcmask 785408   ;;  %v4967_v50 = vmov 0.0  }
  0x39   : > { %v387_v2 = vld [vmem:[%s6357_s1 + $0x10] sm:$0xff]  ;;  %v4509_v3 = vpack.c.bf16 %v386_v1, %v385_v0  ;;  %v388_v4 = vld [vmem:[%s6357_s1 + $0x18] sm:$0xff]  ;;  %v389_v6 = vld [vmem:[%s6357_s1 + $0x20] sm:$0xff]  ;;  %1428 = vst.msk [vmem:[#allocation2] sm:$0xff] %vm1427_vm1, %v4967_v50  ;;  %vm1430_vm2 = vcmask 778240   ;;  %vm1435_vm4 = vcmask 261120  }
  0x3a   : > { %v4513_v5 = vpack.c.bf16 %v388_v4, %v387_v2  ;;  %v390_v7 = vld [vmem:[%s6357_s1 + $0x28] sm:$0xff]  ;;  %v353_v8 = vld [vmem:[%s5133_s19] sm:$0xff]  ;;  %v391_v10 = vld [vmem:[%s6357_s1 + $0x30] sm:$0xff]  ;;  %1432 = vst.msk [vmem:[#allocation2 + $0x10f] sm:$0xff] %vm1427_vm1, %v4967_v50  ;;  %v5243_v52 = vshrl.u32 %v754_v47, 7  ;;  %s4968_s23 = smov 32  }
  0x3b   : > { %4510 = vmatprep.subr.bf16.mxu0 %v4509_v3  ;;  %4125 = vmatprep.mubr.msk.f32.mxu0 %vm400_vm0, %v353_v8  ;;  %v4517_v9 = vpack.c.bf16 %v390_v7, %v389_v6  ;;  %v392_v11 = vld [vmem:[%s6357_s1 + $0x38] sm:$0xff]  ;;  %v354_v13 = vld [vmem:[%s5133_s19 + $0x8] sm:$0xff]  ;;  %v355_v14 = vld [vmem:[%s5133_s19 + $0x10] sm:$0xff]  ;;  %1433 = vst.msk [vmem:[#allocation2 + $0x117] sm:$0xff] %vm1427_vm1, %v4967_v50  ;;  %s4969_s16 = smov 64   ;;  %p6408_p11 = scmp.ne.s32.totalorder %s6370_s21, 0 }
  0x3c   : > { %4512 = vmatpush3.bf16.msra.mxu0 %v4509_v3  ;;  %v4521_v12 = vpack.c.bf16 %v392_v11, %v391_v10  ;;  %v356_v15 = vld [vmem:[%s5133_s19 + $0x18] sm:$0xff]  ;;  %v357_v16 = vld [vmem:[%s5133_s19 + $0x20] sm:$0xff]  ;;  %v358_v17 = vld [vmem:[%s5133_s19 + $0x28] sm:$0xff]  ;;  %1429 = vst.msk [vmem:[#allocation2 + $0x8] sm:$0xff] %vm1427_vm1, %v4967_v50  ;;  %v756_v56 = vadd.s32 8, %v5243_v52  ;;  %v758_v60 = vadd.s32 24, %v5243_v52 }
  0x3d   : > { %4514 = vmatprep.subr.bf16.mxu0 %v4513_v5  ;;  %v359_v18 = vld [vmem:[%s5133_s19 + $0x30] sm:$0xff]  ;;  %v360_v19 = vld [vmem:[%s5133_s19 + $0x38] sm:$0xff]  ;;  %v361_v20 = vld [vmem:[%s5133_s19 + $0x40] sm:$0xff]  ;;  %v791_v63 = vand.u32 15, %v5243_v52  ;;  %1431 = vst.msk [vmem:[#allocation2 + $0x10] sm:$0x1] %vm1430_vm2, %v4967_v50 }
  0x3e   : > { %v362_v21 = vld [vmem:[%s5133_s19 + $0x48] sm:$0xff]  ;;  %v363_v22 = vld [vmem:[%s5133_s19 + $0x50] sm:$0xff]  ;;  %v364_v23 = vld [vmem:[%s5133_s19 + $0x58] sm:$0xff]  ;;  %v798_v62 = vand.u32 15, %v756_v56  ;;  %1434 = vst.msk [vmem:[#allocation2 + $0x11f] sm:$0x1] %vm1430_vm2, %v4967_v50 }
  0x3f   : > { %v365_v24 = vld [vmem:[%s5133_s19 + $0x60] sm:$0xff]  ;;  %v366_v25 = vld [vmem:[%s5133_s19 + $0x68] sm:$0xff]  ;;  %v367_v26 = vld [vmem:[%s5133_s19 + $0x70] sm:$0xff]  ;;  %v812_v6 = vand.u32 15, %v758_v60  ;;  %vm5278_vm5 = vcmp.eq.s32.totalorder %v791_v63, 0  ;;  %v761_v63 = vadd.s32 48, %v5243_v52 }
  0x40   : > { %4516 = vmatpush3.bf16.msra.mxu0 %v4513_v5  ;;  %v368_v27 = vld [vmem:[%s5133_s19 + $0x78] sm:$0xff]  ;;  %v369_v28 = vld [vmem:[%s5133_s19 + $0x80] sm:$0xff]  ;;  %v370_v29 = vld [vmem:[%s5133_s19 + $0x88] sm:$0xff]  ;;  %vm5272_vm3 = vcmp.eq.s32.totalorder %v798_v62, 15  ;;  %s4970_s24 = smov [#allocation6]  }
  0x41   : > { %4518 = vmatprep.subr.bf16.mxu0 %v4517_v9  ;;  %v371_v30 = vld [vmem:[%s5133_s19 + $0x90] sm:$0xff]  ;;  %v372_v31 = vld [vmem:[%s5133_s19 + $0x98] sm:$0xff]  ;;  %v373_v32 = vld [vmem:[%s5133_s19 + $0xa0] sm:$0xff]  ;;  %vm5292_vm6 = vcmp.eq.s32.totalorder %v812_v6, 15  ;;  %s4900_s28 = sshll.u32 %s4970_s24, 4  ;;  %s4901_s28 = int_to_ptr.vmem [resolvable:$false] %s4900_s28 }
  0x42   : > { %v374_v33 = vld [vmem:[%s5133_s19 + $0xa8] sm:$0xff]  ;;  %v375_v34 = vld [vmem:[%s5133_s19 + $0xb0] sm:$0xff]  ;;  %v376_v35 = vld [vmem:[%s5133_s19 + $0xb8] sm:$0xff]  ;;  %s4902_s14 = scalar_lea.vmem %s4901_s28, 8192 }
  0x43   : > { %v377_v36 = vld [vmem:[%s5133_s19 + $0xc0] sm:$0xff]  ;;  %v378_v37 = vld [vmem:[%s5133_s19 + $0xc8] sm:$0xff]  ;;  %v379_v38 = vld [vmem:[%s5133_s19 + $0xd0] sm:$0xff] }
  0x44   : > { %4520 = vmatpush3.bf16.msra.mxu0 %v4517_v9  ;;  %v380_v39 = vld [vmem:[%s5133_s19 + $0xd8] sm:$0xff]  ;;  %v381_v40 = vld [vmem:[%s5133_s19 + $0xe0] sm:$0xff]  ;;  %v382_v41 = vld [vmem:[%s5133_s19 + $0xe8] sm:$0xff]  ;;  %v760_v9 = vadd.s32 40, %v5243_v52 }
  0x45   : > { %4522 = vmatprep.subr.bf16.mxu0 %v4521_v12  ;;  %v383_v42 = vld [vmem:[%s5133_s19 + $0xf0] sm:$0xff]  ;;  %v384_v43 = vld [vmem:[%s5133_s19 + $0xf8] sm:$0xff]  ;;  %v3667_v44 = vld [vmem:[%s6359_s3 + $0x60] sm:$0xff] }
  0x46   : > { %v3668_v45 = vld [vmem:[%s6359_s3 + $0x68] sm:$0xff]  ;;  %v3669_v48 = vld [vmem:[%s6359_s3 + $0x70] sm:$0xff]  ;;  %v3670_v49 = vld [vmem:[%s6359_s3 + $0x78] sm:$0xff] }
  0x47   : > { %v4525_v46 = vpack.c.bf16 %v3668_v45, %v3667_v44  ;;  %v4529_v51 = vpack.c.bf16 %v3670_v49, %v3669_v48  ;;  %v3671_v53 = vld [vmem:[%s6359_s3 + $0x80] sm:$0xff]  ;;  %v3672_v54 = vld [vmem:[%s6359_s3 + $0x88] sm:$0xff]  ;;  %v3673_v57 = vld [vmem:[%s6359_s3 + $0x90] sm:$0xff]  ;;  %v766_v44 = vadd.s32 88, %v5243_v52 }
  0x48   : > { %4524 = vmatpush3.bf16.msra.mxu0 %v4521_v12  ;;  %v4533_v55 = vpack.c.bf16 %v3672_v54, %v3671_v53  ;;  %v3674_v58 = vld [vmem:[%s6359_s3 + $0x98] sm:$0xff]  ;;  %v5262_v61 = vld [vmem:[%s6358_s2] ss:$0 sm:$0xff]  ;;  %v3676_v1 = vld [vmem:[%s6359_s3 + $0xa8] sm:$0xff]  ;;  %v757_v12 = vadd.s32 16, %v5243_v52 }
  0x49   : > { %4526 = vmatprep.subr.bf16.mxu1 %v4525_v46  ;;  %v4537_v59 = vpack.c.bf16 %v3674_v58, %v3673_v57  ;;  %v3675_v0 = vld [vmem:[%s6359_s3 + $0xa0] sm:$0xff]  ;;  %v868_v56 = vand.u32 15, %v766_v44  ;;  %v778_v57 = vadd.s32 184, %v5243_v52 }
  0x4a   : > { %4528 = vmatpush3.bf16.msra.mxu1 %v4525_v46  ;;  %v4541_v3 = vpack.c.bf16 %v3676_v1, %v3675_v0 }
  0x4b   : > { %4126 = vmatmul.mubr.msk.f32.vlgmr.msra.gmra.mrb[0].mxu0 %vm400_vm0, %v354_v13  ;;  %4530 = vmatprep.subr.bf16.mxu1 %v4529_v51  ;;  %v3677_v13 = vld [vmem:[%s6359_s3 + $0xb0] sm:$0xff]  ;;  %vm5358_vm12 = vcmp.eq.s32.totalorder %v868_v56, 15 }
  0x4c   : > { %4128 = vmatprep.mubr.msk.f32.mxu0 %vm400_vm0, %v355_v14  ;;  %v3678_v14 = vld [vmem:[%s6359_s3 + $0xb8] sm:$0xff] }
  0x4e   : > { %4532 = vmatpush3.bf16.msra.mxu1 %v4529_v51 }
  0x4f   : > { %4129 = vmatmul.mubr.msk.f32.gmra.mrb[2].mxu0 %vm400_vm0, %v356_v15  ;;  %4534 = vmatprep.subr.bf16.mxu1 %v4533_v55 }
  0x50   : > { %4131 = vmatprep.mubr.msk.f32.mxu0 %vm400_vm0, %v357_v16 }
  0x52   : > { %4536 = vmatpush3.bf16.msra.mxu1 %v4533_v55 }
  0x53   : > { %4132 = vmatmul.mubr.msk.f32.gmra.mrb[4].mxu0 %vm400_vm0, %v358_v17  ;;  %4538 = vmatprep.subr.bf16.mxu1 %v4537_v59  ;;  %v4545_v17 = vpack.c.bf16 %v3678_v14, %v3677_v13 }
  0x54   : > { %4134 = vmatprep.mubr.msk.f32.mxu0 %vm400_vm0, %v359_v18 }
  0x56   : > { %4540 = vmatpush3.bf16.msra.mxu1 %v4537_v59  ;;  %v768_v59 = vadd.s32 104, %v5243_v52 }
  0x57   : > { %4135 = vmatmul.mubr.msk.f32.gmra.mrb[6].mxu0 %vm400_vm0, %v360_v19  ;;  %4542 = vmatprep.subr.bf16.mxu1 %v4541_v3 }
  0x58   : > { %4137 = vmatprep.mubr.msk.f32.mxu0 %vm400_vm0, %v361_v20  ;;  %v772_v20 = vadd.s32 136, %v5243_v52 }
  0x5a   : > { %4544 = vmatpush3.bf16.msra.mxu1 %v4541_v3 }
  0x5b   : > { %4138 = vmatmul.mubr.msk.f32.gmra.mrb[8].mxu0 %vm400_vm0, %v362_v21  ;;  %4546 = vmatprep.subr.bf16.mxu1 %v4545_v17 }
  0x5c   : > { %4140 = vmatprep.mubr.msk.f32.mxu0 %vm400_vm0, %v363_v22 }
  0x5e   : > { %4548 = vmatpush3.bf16.msra.mxu1 %v4545_v17  ;;  %v782_v17 = vadd.s32 216, %v5243_v52 }
  0x5f   : > { %4141 = vmatmul.mubr.msk.f32.gmra.mrb[10].mxu0 %vm400_vm0, %v364_v23 }
  0x60   : > { %4143 = vmatprep.mubr.msk.f32.mxu0 %vm400_vm0, %v365_v24  ;;  %v826_v24 = vand.u32 15, %v760_v9  ;;  %v770_v9 = vadd.s32 120, %v5243_v52 }
  0x62   : > { %vm5310_vm7 = vcmp.eq.s32.totalorder %v826_v24, 15 }
  0x63   : > { %4144 = vmatmul.mubr.msk.f32.gmra.mrb[12].mxu0 %vm400_vm0, %v366_v25  ;;  %v762_v25 = vadd.s32 56, %v5243_v52 }
  0x64   : > { %4146 = vmatprep.mubr.msk.f32.mxu0 %vm400_vm0, %v367_v26 }
  0x67   : > { %4147 = vmatmul.mubr.msk.f32.gmra.mrb[14].mxu0 %vm400_vm0, %v368_v27  ;;  %v805_v27 = vand.u32 15, %v757_v12 }
  0x68   : > { %4149 = vmatprep.mubr.msk.f32.mxu0 %vm400_vm0, %v369_v28 }
  0x69   : > { %vm1301_vm8 = vcmp.eq.s32.totalorder %v805_v27, 0 }
  0x6b   : > { %4150 = vmatmul.mubr.msk.f32.gmra.mrb[16].mxu0 %vm400_vm0, %v370_v29 }
  0x6c   : > { %4152 = vmatprep.mubr.msk.f32.mxu0 %vm400_vm0, %v371_v30 }
  0x6f   : > { %4153 = vmatmul.mubr.msk.f32.gmra.mrb[18].mxu0 %vm400_vm0, %v372_v31 }
  0x70   : > { %4155 = vmatprep.mubr.msk.f32.mxu0 %vm400_vm0, %v373_v32 }
  0x73   : > { %4156 = vmatmul.mubr.msk.f32.gmra.mrb[20].mxu0 %vm400_vm0, %v374_v33 }
  0x74   : > { %4158 = vmatprep.mubr.msk.f32.mxu0 %vm400_vm0, %v375_v34 }
  0x77   : > { %4159 = vmatmul.mubr.msk.f32.gmra.mrb[22].mxu0 %vm400_vm0, %v376_v35  ;;  %v840_v35 = vand.u32 15, %v762_v25 }
  0x78   : > { %4161 = vmatprep.mubr.msk.f32.mxu0 %vm400_vm0, %v377_v36  ;;  %v764_v36 = vadd.s32 72, %v5243_v52 }
  0x79   : > { %vm1178_vm9 = vcmp.eq.s32.totalorder %v840_v35, 15 }
  0x7a   : > { %v854_v47 = vand.u32 15, %v764_v36 }
  0x7b   : > { %4162 = vmatmul.mubr.msk.f32.gmra.mrb[24].mxu0 %vm400_vm0, %v378_v37 }
  0x7c   : > { %4164 = vmatprep.mubr.msk.f32.mxu0 %vm400_vm0, %v379_v38  ;;  %v759_v38 = vadd.s32 32, %v5243_v52  ;;  %vm5337_vm10 = vcmp.eq.s32.totalorder %v854_v47, 15 }
  0x7e   : > { %v819_v49 = vand.u32 15, %v759_v38 }
  0x7f   : > { %4165 = vmatmul.mubr.msk.f32.gmra.mrb[26].mxu0 %vm400_vm0, %v380_v39 }
  0x80   : > { %4167 = vmatprep.mubr.msk.f32.mxu0 %vm400_vm0, %v381_v40  ;;  %vm5344_vm11 = vcmp.eq.s32.totalorder %v819_v49, 0 }
  0x83   : > { %4168 = vmatmul.mubr.msk.f32.gmra.mrb[28].mxu0 %vm400_vm0, %v382_v41 }
  0x84   : > { %4170 = vmatprep.mubr.msk.f32.mxu0 %vm400_vm0, %v383_v42 }
  0x87   : > { %4171 = vmatmul.mubr.msk.f32.gmra.mrb[30].mxu0 %vm400_vm0, %v384_v43 }
 0x11e   : > { %v4127_v2 = vpop.f32.mrb[0].mxu0 }
 0x11f   : > { %v569_v4 = vadd.f32 %v4127_v2, %v5262_v61  ;;  %v563_v5 = vpop.f32.mrb[1].mxu0 }
 0x120   : > { %v564_v8 = vadd.f32 %v5262_v61, %v563_v5 }
 0x121   : > { %v723_v10 = vmax.f32 %v569_v4, 0.0 }
 0x122   : > { %v722_v15 = vmax.f32 %v564_v8, 0.0  ;;  %v4130_v16 = vpop.f32.mrb[2].mxu0  ;;  %v882_v8 = vand.u32 15, %v768_v59 }
 0x123   : > { %v1268_v18 = vsel %vm5272_vm3, 0.0, %v723_v10  ;;  %v579_v19 = vadd.f32 %v4130_v16, %v5262_v61  ;;  %1502 = vrot.lane.b32.xlu0 %v723_v10, %s4968_s23  ;;  %v573_v21 = vpop.f32.mrb[3].mxu0 }
 0x124   : > { %1437 = vst.msk [vmem:[#allocation2 + $0x19] sm:$0xff] %vm1435_vm4, %v1268_v18  ;;  %1436 = vst.msk [vmem:[#allocation2 + $0x11] sm:$0xff] %vm1435_vm4, %v722_v15  ;;  %v574_v22 = vadd.f32 %v5262_v61, %v573_v21  ;;  %v1395_v23 = vsel %vm5278_vm5, 0.0, %v722_v15  ;;  %vm5383_vm13 = vcmp.eq.s32.totalorder %v882_v8, 15  ;;  %v767_v8 = vadd.s32 96, %v5243_v52 }
 0x125   : > { %v725_v26 = vmax.f32 %v579_v19, 0.0  ;;  %1661 = vrot.lane.b32.xlu1 %v1395_v23, %s4969_s16  ;;  %v896_v19 = vand.u32 15, %v770_v9 }
 0x126   : > { %v724_v28 = vmax.f32 %v574_v22, 0.0  ;;  %v4133_v29 = vpop.f32.mrb[4].mxu0  ;;  %v763_v22 = vadd.s32 64, %v5243_v52 }
 0x127   : > { %v1270_v30 = vsel %vm5292_vm6, 0.0, %v725_v26  ;;  %1663 = vrot.lane.b32.xlu0 %v723_v10, %s4969_s16  ;;  %v589_v31 = vadd.f32 %v4133_v29, %v5262_v61  ;;  %v583_v32 = vpop.f32.mrb[5].mxu0  ;;  %v833_v10 = vand.u32 15, %v761_v63  ;;  %v774_v29 = vadd.s32 152, %v5243_v52 }
 0x128   : > { %1439 = vst.msk [vmem:[#allocation2 + $0x29] sm:$0xff] %vm1435_vm4, %v1270_v30  ;;  %1438 = vst.msk [vmem:[#allocation2 + $0x21] sm:$0xff] %vm1435_vm4, %v724_v28  ;;  %v584_v34 = vadd.f32 %v5262_v61, %v583_v32  ;;  %v1397_v45 = vsel %vm1301_vm8, 0.0, %v724_v28  ;;  %vm1186_vm15 = vcmp.eq.s32.totalorder %v896_v19, 15  ;;  %v910_v32 = vand.u32 15, %v772_v20 }
 0x129   : > { %1504 = vrot.lane.b32.xlu1 %v724_v28, %s4968_s23  ;;  %v5317_v37 = vmax.f32 %v589_v31, 0.0  ;;  %vm5390_vm14 = vcmp.eq.s32.totalorder %v833_v10, 0  ;;  %v847_v33 = vand.u32 15, %v763_v22  ;;  %v875_v20 = vand.u32 15, %v767_v8  ;;  %v1823_v8 = vld [vmem:[%s6359_s3 + $0x8] sm:$0xff] }
 0x12a   : > { %v726_v39 = vmax.f32 %v584_v34, 0.0  ;;  %v4136_v40 = vpop.f32.mrb[6].mxu0  ;;  %vm5424_vm2 = vcmp.eq.s32.totalorder %v910_v32, 15 }
 0x12b   : > { %v1272_v41 = vsel %vm5310_vm7, 0.0, %v5317_v37  ;;  %1500 = vrot.lane.b32.xlu0 %v722_v15, %s4968_s23  ;;  %v599_v42 = vadd.f32 %v4136_v40, %v5262_v61  ;;  %v593_v43 = vpop.f32.mrb[7].mxu0  ;;  %v924_v40 = vand.u32 15, %v774_v29  ;;  %vm5432_vm3 = vcmp.eq.s32.totalorder %v847_v33, 0 }
 0x12c   : > { %1441 = vst.msk [vmem:[#allocation2 + $0x39] sm:$0xff] %vm1435_vm4, %v1272_v41  ;;  %1440 = vst.msk [vmem:[#allocation2 + $0x31] sm:$0xff] %vm1435_vm4, %v726_v39  ;;  %v594_v46 = vadd.f32 %v5262_v61, %v593_v43  ;;  %v1399_v6 = vsel %vm5344_vm11, 0.0, %v726_v39  ;;  %v776_v43 = vadd.s32 168, %v5243_v52  ;;  %v769_v33 = vadd.s32 112, %v5243_v52 }
 0x12d   : > { %1665 = vrot.lane.b32.xlu1 %v1397_v45, %s4969_s16  ;;  %v5330_v48 = vmax.f32 %v599_v42, 0.0  ;;  %v765_v45 = vadd.s32 80, %v5243_v52  ;;  %vm5447_vm5 = vcmp.eq.s32.totalorder %v924_v40, 15 }
 0x12e   : > { %v728_v50 = vmax.f32 %v594_v46, 0.0  ;;  %v4139_v51 = vpop.f32.mrb[8].mxu0  ;;  %v938_v56 = vand.u32 15, %v776_v43 }
 0x12f   : > { %1506 = vrot.lane.b32.xlu0 %v725_v26, %s4968_s23  ;;  %v1274_v53 = vsel %vm1178_vm9, 0.0, %v5330_v48  ;;  %v609_v54 = vadd.f32 %v4139_v51, %v5262_v61  ;;  %v603_v55 = vpop.f32.mrb[9].mxu0 }
 0x130   : > { %1443 = vst.msk [vmem:[#allocation2 + $0x49] sm:$0xff] %vm1435_vm4, %v1274_v53  ;;  %1442 = vst.msk [vmem:[#allocation2 + $0x41] sm:$0xff] %vm1435_vm4, %v728_v50  ;;  %v604_v58 = vadd.f32 %v5262_v61, %v603_v55  ;;  %v1401_v30 = vsel %vm5390_vm14, 0.0, %v728_v50  ;;  %vm5473_vm6 = vcmp.eq.s32.totalorder %v938_v56, 15 }
 0x131   : > { %1508 = vrot.lane.b32.xlu1 %v726_v39, %s4968_s23  ;;  %v5348_v62 = vmax.f32 %v609_v54, 0.0 }
 0x132   : > { %v5351_v0 = vmax.f32 %v604_v58, 0.0  ;;  %v4142_v1 = vpop.f32.mrb[10].mxu0  ;;  %v861_v58 = vand.u32 15, %v765_v45  ;;  %v786_v45 = vadd.s32 248, %v5243_v52 }
 0x133   : > { %1667 = vrot.lane.b32.xlu0 %v725_v26, %s4969_s16  ;;  %v1276_v2 = vsel %vm5337_vm10, 0.0, %v5348_v62  ;;  %v619_v3 = vadd.f32 %v4142_v1, %v5262_v61  ;;  %v613_v5 = vpop.f32.mrb[11].mxu0  ;;  %vm5524_vm10 = vcmp.eq.s32.totalorder %v875_v20, 0 }
 0x134   : > { %1445 = vst.msk [vmem:[#allocation2 + $0x59] sm:$0xff] %vm1435_vm4, %v1276_v2  ;;  %1444 = vst.msk [vmem:[#allocation2 + $0x51] sm:$0xff] %vm1435_vm4, %v5351_v0  ;;  %v614_v7 = vadd.f32 %v5262_v61, %v613_v5  ;;  %v1403_v55 = vsel %vm5432_vm3, 0.0, %v5351_v0  ;;  %v952_v5 = vand.u32 15, %v778_v57  ;;  %vm5481_vm7 = vcmp.eq.s32.totalorder %v861_v58, 0 }
 0x135   : > { %1669 = vrot.lane.b32.xlu1 %v1399_v6, %s4969_s16  ;;  %v5370_v11 = vmax.f32 %v619_v3, 0.0  ;;  %v780_v6 = vadd.s32 200, %v5243_v52  ;;  %v1008_v56 = vand.u32 15, %v786_v45  ;;  %v771_v57 = vadd.s32 128, %v5243_v52  ;;  %v1827_v45 = vld [vmem:[%s6359_s3 + $0x28] sm:$0xff] }
 0x136   : > { %v5372_v12 = vmax.f32 %v614_v7, 0.0  ;;  %v4145_v13 = vpop.f32.mrb[12].mxu0  ;;  %vm1194_vm8 = vcmp.eq.s32.totalorder %v952_v5, 15 }
 0x137   : > { %1510 = vrot.lane.b32.xlu0 %v5317_v37, %s4968_s23  ;;  %v1278_v14 = vsel %vm5358_vm12, 0.0, %v5370_v11  ;;  %v629_v15 = vadd.f32 %v4145_v13, %v5262_v61  ;;  %v623_v16 = vpop.f32.mrb[13].mxu0  ;;  %v966_v19 = vand.u32 15, %v780_v6  ;;  %vm1202_vm14 = vcmp.eq.s32.totalorder %v1008_v56, 15 }
 0x138   : > { %1447 = vst.msk [vmem:[#allocation2 + $0x69] sm:$0xff] %vm1435_vm4, %v1278_v14  ;;  %1446 = vst.msk [vmem:[#allocation2 + $0x61] sm:$0xff] %vm1435_vm4, %v5372_v12  ;;  %v624_v18 = vadd.f32 %v5262_v61, %v623_v16  ;;  %v903_v6 = vand.u32 15, %v771_v57 }
 0x139   : > { %1512 = vrot.lane.b32.xlu1 %v728_v50, %s4968_s23  ;;  %v5395_v23 = vmax.f32 %v629_v15, 0.0  ;;  %vm5516_vm9 = vcmp.eq.s32.totalorder %v966_v19, 15 }
 0x13a   : > { %v5397_v24 = vmax.f32 %v624_v18, 0.0  ;;  %v4148_v25 = vpop.f32.mrb[14].mxu0  ;;  %v1405_v18 = vsel %vm5481_vm7, 0.0, %v5372_v12 }
 0x13b   : > { %1671 = vrot.lane.b32.xlu0 %v5317_v37, %s4969_s16  ;;  %v1280_v26 = vsel %vm5383_vm13, 0.0, %v5395_v23  ;;  %v639_v27 = vadd.f32 %v4148_v25, %v5262_v61  ;;  %v633_v28 = vpop.f32.mrb[15].mxu0 }
 0x13c   : > { %1449 = vst.msk [vmem:[#allocation2 + $0x79] sm:$0xff] %vm1435_vm4, %v1280_v26  ;;  %1448 = vst.msk [vmem:[#allocation2 + $0x71] sm:$0xff] %vm1435_vm4, %v5397_v24  ;;  %v634_v31 = vadd.f32 %v5262_v61, %v633_v28  ;;  %v980_v28 = vand.u32 15, %v782_v17  ;;  %v1407_v43 = vsel %vm5524_vm10, 0.0, %v5397_v24  ;;  %v775_v17 = vadd.s32 160, %v5243_v52 }
 0x13d   : > { %1673 = vrot.lane.b32.xlu1 %v1401_v30, %s4969_s16  ;;  %v5413_v34 = vmax.f32 %v639_v27, 0.0 }
 0x13e   : > { %v5415_v35 = vmax.f32 %v634_v31, 0.0  ;;  %v4151_v36 = vpop.f32.mrb[16].mxu0  ;;  %v784_v31 = vadd.s32 232, %v5243_v52  ;;  %vm5539_vm11 = vcmp.eq.s32.totalorder %v980_v28, 15 }
 0x13f   : > { %1514 = vrot.lane.b32.xlu0 %v5330_v48, %s4968_s23  ;;  %v1282_v37 = vsel %vm1186_vm15, 0.0, %v5413_v34  ;;  %v649_v38 = vadd.f32 %v4151_v36, %v5262_v61  ;;  %v643_v39 = vpop.f32.mrb[17].mxu0  ;;  %vm1315_vm15 = vcmp.eq.s32.totalorder %v903_v6, 0 }
 0x140   : > { %1451 = vst.msk [vmem:[#allocation2 + $0x89] sm:$0xff] %vm1435_vm4, %v1282_v37  ;;  %1450 = vst.msk [vmem:[#allocation2 + $0x81] sm:$0xff] %vm1435_vm4, %v5415_v35  ;;  %v644_v42 = vadd.f32 %v5262_v61, %v643_v39  ;;  %v994_v44 = vand.u32 15, %v784_v31 }
 0x141   : > { %1516 = vrot.lane.b32.xlu1 %v5351_v0, %s4968_s23  ;;  %v5437_v46 = vmax.f32 %v649_v38, 0.0 }
 0x142   : > { %v5439_v47 = vmax.f32 %v644_v42, 0.0  ;;  %v4154_v49 = vpop.f32.mrb[18].mxu0  ;;  %vm1200_vm12 = vcmp.eq.s32.totalorder %v994_v44, 15  ;;  %v1826_v44 = vld [vmem:[%s6359_s3 + $0x20] sm:$0xff] }
 0x143   : > { %1675 = vrot.lane.b32.xlu0 %v5330_v48, %s4969_s16  ;;  %v1284_v50 = vsel %vm5424_vm2, 0.0, %v5437_v46  ;;  %v659_v51 = vadd.f32 %v4154_v49, %v5262_v61  ;;  %v653_v54 = vpop.f32.mrb[19].mxu0  ;;  %v889_v49 = vand.u32 15, %v769_v33 }
 0x144   : > { %1453 = vst.msk [vmem:[#allocation2 + $0x99] sm:$0xff] %vm1435_vm4, %v1284_v50  ;;  %1452 = vst.msk [vmem:[#allocation2 + $0x91] sm:$0xff] %vm1435_vm4, %v5439_v47  ;;  %v654_v48 = vadd.f32 %v5262_v61, %v653_v54 }
 0x145   : > { %1677 = vrot.lane.b32.xlu1 %v1403_v55, %s4969_s16  ;;  %v5460_v59 = vmax.f32 %v659_v51, 0.0  ;;  %vm1313_vm13 = vcmp.eq.s32.totalorder %v889_v49, 0 }
 0x146   : > { %v5462_v60 = vmax.f32 %v654_v48, 0.0  ;;  %v4157_v63 = vpop.f32.mrb[20].mxu0 }
 0x147   : > { %1518 = vrot.lane.b32.xlu0 %v5348_v62, %s4968_s23  ;;  %v1286_v0 = vsel %vm5447_vm5, 0.0, %v5460_v59  ;;  %v669_v1 = vadd.f32 %v4157_v63, %v5262_v61  ;;  %v663_v2 = vpop.f32.mrb[21].mxu0 }
 0x148   : > { %1455 = vst.msk [vmem:[#allocation2 + $0xa9] sm:$0xff] %vm1435_vm4, %v1286_v0  ;;  %1454 = vst.msk [vmem:[#allocation2 + $0xa1] sm:$0xff] %vm1435_vm4, %v5462_v60  ;;  %v664_v4 = vadd.f32 %v5262_v61, %v663_v2 }
 0x149   : > { %1520 = vrot.lane.b32.xlu1 %v5372_v12, %s4968_s23  ;;  %v5486_v9 = vmax.f32 %v669_v1, 0.0 }
 0x14a   : > { %v5488_v10 = vmax.f32 %v664_v4, 0.0  ;;  %v4160_v13 = vpop.f32.mrb[22].mxu0  ;;  %v1409_v4 = vsel %vm1313_vm13, 0.0, %v5415_v35 }
 0x14b   : > { %1679 = vrot.lane.b32.xlu0 %v5348_v62, %s4969_s16  ;;  %v1288_v14 = vsel %vm5473_vm6, 0.0, %v5486_v9  ;;  %v679_v15 = vadd.f32 %v4160_v13, %v5262_v61  ;;  %v673_v16 = vpop.f32.mrb[23].mxu0  ;;  %v773_v13 = vadd.s32 144, %v5243_v52 }
 0x14c   : > { %1457 = vst.msk [vmem:[#allocation2 + $0xb9] sm:$0xff] %vm1435_vm4, %v1288_v14  ;;  %1456 = vst.msk [vmem:[#allocation2 + $0xb1] sm:$0xff] %vm1435_vm4, %v5488_v10  ;;  %v674_v62 = vadd.f32 %v5262_v61, %v673_v16 }
 0x14d   : > { %1681 = vrot.lane.b32.xlu1 %v1405_v18, %s4969_s16  ;;  %v5505_v21 = vmax.f32 %v679_v15, 0.0  ;;  %v1411_v15 = vsel %vm1315_vm15, 0.0, %v5439_v47  ;;  %v917_v16 = vand.u32 15, %v773_v13  ;;  %v777_v18 = vadd.s32 176, %v5243_v52 }
 0x14e   : > { %v5507_v22 = vmax.f32 %v674_v62, 0.0  ;;  %v4163_v25 = vpop.f32.mrb[24].mxu0 }
 0x14f   : > { %1522 = vrot.lane.b32.xlu0 %v5370_v11, %s4968_s23  ;;  %v1290_v12 = vsel %vm1194_vm8, 0.0, %v5505_v21  ;;  %v689_v26 = vadd.f32 %v4163_v25, %v5262_v61  ;;  %v683_v27 = vpop.f32.mrb[25].mxu0  ;;  %vm1317_vm2 = vcmp.eq.s32.totalorder %v917_v16, 0 }
 0x150   : > { %1459 = vst.msk [vmem:[#allocation2 + $0xc9] sm:$0xff] %vm1435_vm4, %v1290_v12  ;;  %1458 = vst.msk [vmem:[#allocation2 + $0xc1] sm:$0xff] %vm1435_vm4, %v5507_v22  ;;  %v684_v30 = vadd.f32 %v5262_v61, %v683_v27  ;;  %v785_v12 = vadd.s32 240, %v5243_v52 }
 0x151   : > { %1524 = vrot.lane.b32.xlu1 %v5397_v24, %s4968_s23  ;;  %v5529_v36 = vmax.f32 %v689_v26, 0.0 }
 0x152   : > { %v5531_v37 = vmax.f32 %v684_v30, 0.0  ;;  %v4166_v38 = vpop.f32.mrb[26].mxu0  ;;  %v1001_v28 = vand.u32 15, %v785_v12 }
 0x153   : > { %1683 = vrot.lane.b32.xlu0 %v5370_v11, %s4969_s16  ;;  %v1292_v39 = vsel %vm5516_vm9, 0.0, %v5529_v36  ;;  %v699_v40 = vadd.f32 %v4166_v38, %v5262_v61  ;;  %v693_v42 = vpop.f32.mrb[27].mxu0  ;;  %vm1596_vm9 = vcmask 523520   ;;  %v1824_v38 = vld [vmem:[%s6359_s3 + $0x10] sm:$0xff] }
 0x154   : > { %1461 = vst.msk [vmem:[#allocation2 + $0xd9] sm:$0xff] %vm1435_vm4, %v1292_v39  ;;  %1460 = vst.msk [vmem:[#allocation2 + $0xd1] sm:$0xff] %vm1435_vm4, %v5531_v37  ;;  %v694_v11 = vadd.f32 %v5262_v61, %v693_v42  ;;  %vm1329_vm10 = vcmp.eq.s32.totalorder %v1001_v28, 0  ;;  %v1825_v39 = vld [vmem:[%s6359_s3 + $0x18] sm:$0xff] }
 0x155   : > { %1685 = vrot.lane.b32.xlu1 %v1407_v43, %s4969_s16  ;;  %v5552_v50 = vmax.f32 %v699_v40, 0.0  ;;  %v4553_v42 = vpack.c.bf16 %v1825_v39, %v1824_v38 }
 0x156   : > { %v5554_v51 = vmax.f32 %v694_v11, 0.0  ;;  %v4169_v53 = vpop.f32.mrb[28].mxu0 }
 0x157   : > { %1526 = vrot.lane.b32.xlu0 %v5395_v23, %s4968_s23  ;;  %v1294_v24 = vsel %vm5539_vm11, 0.0, %v5552_v50  ;;  %v709_v54 = vadd.f32 %v4169_v53, %v5262_v61  ;;  %v703_v55 = vpop.f32.mrb[29].mxu0  ;;  %vm1757_vm11 = vcmask 785920   ;;  %v1828_v53 = vld [vmem:[%s6359_s3 + $0x30] sm:$0xff] }
 0x158   : > { %1463 = vst.msk [vmem:[#allocation2 + $0xe9] sm:$0xff] %vm1435_vm4, %v1294_v24  ;;  %1462 = vst.msk [vmem:[#allocation2 + $0xe1] sm:$0xff] %vm1435_vm4, %v5554_v51  ;;  %v704_v48 = vadd.f32 %v5262_v61, %v703_v55  ;;  %v1829_v24 = vld [vmem:[%s6359_s3 + $0x38] sm:$0xff] }
 0x159   : > { %1528 = vrot.lane.b32.xlu1 %v5415_v35, %s4968_s23  ;;  %v5569_v58 = vmax.f32 %v709_v54, 0.0 }
 0x15a   : > { %v5571_v63 = vmax.f32 %v704_v48, 0.0  ;;  %v4172_v0 = vpop.f32.mrb[30].mxu0  ;;  %v4561_v48 = vpack.c.bf16 %v1829_v24, %v1828_v53 }
 0x15b   : > { %1687 = vrot.lane.b32.xlu0 %v5395_v23, %s4969_s16  ;;  %v1296_v1 = vsel %vm1200_vm12, 0.0, %v5569_v58  ;;  %v719_v2 = vadd.f32 %v4172_v0, %v5262_v61  ;;  %v713_v3 = vpop.f32.mrb[31].mxu0 }
 0x15c   : > { %1465 = vst.msk [vmem:[#allocation2 + $0xf9] sm:$0xff] %vm1435_vm4, %v1296_v1  ;;  %1464 = vst.msk [vmem:[#allocation2 + $0xf1] sm:$0xff] %vm1435_vm4, %v5571_v63  ;;  %v714_v5 = vadd.f32 %v5262_v61, %v713_v3  ;;  %v1822_v61 = vld [vmem:[%s6359_s3] sm:$0xff]  ;;  %v1832_v3 = vld [vmem:[%s6359_s3 + $0x50] sm:$0xff] }
 0x15d   : > { %1689 = vrot.lane.b32.xlu1 %v1409_v4, %s4969_s16  ;;  %v5583_v7 = vmax.f32 %v719_v2, 0.0  ;;  %v5602_v14 = vpack.c.bf16 %v1823_v8, %v1822_v61  ;;  %v1833_v4 = vld [vmem:[%s6359_s3 + $0x58] sm:$0xff]  ;;  %v3743_v61 = vld [vmem:[%s6359_s3 + $0xc0] sm:$0xff]  ;;  %v3744_v8 = vld [vmem:[%s6359_s3 + $0xc8] sm:$0xff] }
 0x15e   : > { %v5585_v23 = vmax.f32 %v714_v5, 0.0 }
 0x15f   : > { %1530 = vrot.lane.b32.xlu0 %v5413_v34, %s4968_s23  ;;  %v1298_v35 = vsel %vm1202_vm14, 0.0, %v5583_v7  ;;  %4550 = vmatprep.subr.bf16.mxu1 %v5602_v14 }
 0x160   : > { %1467 = vst.msk [vmem:[#allocation2 + $0x109] sm:$0xff] %vm1435_vm4, %v1298_v35  ;;  %1466 = vst.msk [vmem:[#allocation2 + $0x101] sm:$0xff] %vm1435_vm4, %v5585_v23  ;;  %v1425_v31 = vsel %vm1329_vm10, 0.0, %v5585_v23 }
 0x161   : > { %1532 = vrot.lane.b32.xlu1 %v5439_v47, %s4968_s23  ;;  %v931_v47 = vand.u32 15, %v775_v17 }
 0x163   : > { %1691 = vrot.lane.b32.xlu0 %v5413_v34, %s4969_s16  ;;  %v1413_v34 = vsel %vm1317_vm2, 0.0, %v5462_v60  ;;  %vm1319_vm3 = vcmp.eq.s32.totalorder %v931_v47, 0 }
 0x164   : > { %v1415_v62 = vsel %vm1319_vm3, 0.0, %v5488_v10 }
 0x165   : > { %1693 = vrot.lane.b32.xlu1 %v1411_v15, %s4969_s16 }
 0x167   : > { %1534 = vrot.lane.b32.xlu0 %v5437_v46, %s4968_s23 }
 0x169   : > { %1536 = vrot.lane.b32.xlu1 %v5462_v60, %s4968_s23  ;;  %v779_v60 = vadd.s32 192, %v5243_v52 }
 0x16b   : > { %1695 = vrot.lane.b32.xlu0 %v5437_v46, %s4969_s16  ;;  %v945_v46 = vand.u32 15, %v777_v18 }
 0x16d   : > { %1697 = vrot.lane.b32.xlu1 %v1413_v34, %s4969_s16  ;;  %vm1321_vm5 = vcmp.eq.s32.totalorder %v945_v46, 0 }
 0x16e   : > { %v1417_v19 = vsel %vm1321_vm5, 0.0, %v5507_v22 }
 0x16f   : > { %1538 = vrot.lane.b32.xlu0 %v5460_v59, %s4968_s23 }
 0x171   : > { %1540 = vrot.lane.b32.xlu1 %v5488_v10, %s4968_s23  ;;  %v781_v10 = vadd.s32 208, %v5243_v52 }
 0x173   : > { %1699 = vrot.lane.b32.xlu0 %v5460_v59, %s4969_s16  ;;  %v959_v59 = vand.u32 15, %v779_v60 }
 0x175   : > { %1701 = vrot.lane.b32.xlu1 %v1415_v62, %s4969_s16  ;;  %vm1323_vm6 = vcmp.eq.s32.totalorder %v959_v59, 0 }
 0x176   : > { %v1419_v20 = vsel %vm1323_vm6, 0.0, %v5531_v37 }
 0x177   : > { %1542 = vrot.lane.b32.xlu0 %v5486_v9, %s4968_s23 }
 0x179   : > { %1544 = vrot.lane.b32.xlu1 %v5507_v22, %s4968_s23  ;;  %v783_v22 = vadd.s32 224, %v5243_v52 }
 0x17b   : > { %1703 = vrot.lane.b32.xlu0 %v5486_v9, %s4969_s16  ;;  %v973_v9 = vand.u32 15, %v781_v10 }
 0x17d   : > { %1705 = vrot.lane.b32.xlu1 %v1417_v19, %s4969_s16  ;;  %vm1325_vm7 = vcmp.eq.s32.totalorder %v973_v9, 0 }
 0x17e   : > { %v1421_v25 = vsel %vm1325_vm7, 0.0, %v5554_v51 }
 0x17f   : > { %1546 = vrot.lane.b32.xlu0 %v5505_v21, %s4968_s23 }
 0x181   : > { %1548 = vrot.lane.b32.xlu1 %v5531_v37, %s4968_s23 }
 0x183   : > { %1707 = vrot.lane.b32.xlu0 %v5505_v21, %s4969_s16  ;;  %v987_v21 = vand.u32 15, %v783_v22 }
 0x185   : > { %1709 = vrot.lane.b32.xlu1 %v1419_v20, %s4969_s16  ;;  %vm1327_vm8 = vcmp.eq.s32.totalorder %v987_v21, 0 }
 0x186   : > { %v1423_v26 = vsel %vm1327_vm8, 0.0, %v5571_v63 }
 0x187   : > { %1550 = vrot.lane.b32.xlu0 %v5529_v36, %s4968_s23 }
 0x189   : > { %1552 = vrot.lane.b32.xlu1 %v5554_v51, %s4968_s23 }
 0x18b   : > { %1711 = vrot.lane.b32.xlu0 %v5529_v36, %s4969_s16 }
 0x18d   : > { %1713 = vrot.lane.b32.xlu1 %v1421_v25, %s4969_s16 }
 0x18f   : > { %1554 = vrot.lane.b32.xlu0 %v5552_v50, %s4968_s23 }
 0x191   : > { %1556 = vrot.lane.b32.xlu1 %v5571_v63, %s4968_s23  ;;  %v1831_v63 = vld [vmem:[%s6359_s3 + $0x48] sm:$0xff] }
 0x193   : > { %1715 = vrot.lane.b32.xlu0 %v5552_v50, %s4969_s16  ;;  %v4557_v50 = vpack.c.bf16 %v1827_v45, %v1826_v44 }
 0x195   : > { %v1503_v27 = vpop.permute.xlu0 %1502  ;;  %1717 = vrot.lane.b32.xlu1 %v1423_v26, %s4969_s16 }
 0x196   : > { %1598 = vst.msk [vmem:[#allocation2 + $0x18] sm:$0xff] %vm1596_vm9, %v1503_v27 }
 0x197   : > { %1558 = vrot.lane.b32.xlu0 %v5569_v58, %s4968_s23  ;;  %v1662_v29 = vpop.permute.xlu1 %1661 }
 0x199   : > { %v1664_v30 = vpop.permute.xlu0 %1663  ;;  %1560 = vrot.lane.b32.xlu1 %v5585_v23, %s4968_s23 }
 0x19b   : > { %1719 = vrot.lane.b32.xlu0 %v5569_v58, %s4969_s16  ;;  %v1505_v52 = vpop.permute.xlu1 %1504  ;;  %v1830_v58 = vld [vmem:[%s6359_s3 + $0x40] sm:$0xff] }
 0x19c   : > { %1599 = vst.msk [vmem:[#allocation2 + $0x20] sm:$0xff] %vm1596_vm9, %v1505_v52  ;;  %v4565_v1 = vpack.c.bf16 %v1831_v63, %v1830_v58 }
 0x19d   : > { %v1501_v32 = vpop.permute.xlu0 %1500  ;;  %1721 = vrot.lane.b32.xlu1 %v1425_v31, %s4969_s16 }
 0x19e   : > { %1597 = vst.msk [vmem:[#allocation2 + $0x10] sm:$0xff] %vm1596_vm9, %v1501_v32 }
 0x19f   : > { %1758 = vst.msk [vmem:[#allocation2 + $0xf] sm:$0xff] %vm1757_vm11, %v1662_v29  ;;  %1759 = vst.msk [vmem:[#allocation2 + $0x17] sm:$0xff] %vm1757_vm11, %v1664_v30  ;;  %1562 = vrot.lane.b32.xlu0 %v5583_v7, %s4968_s23  ;;  %v1666_v33 = vpop.permute.xlu1 %1665 }
 0x1a0   : > { %1760 = vst.msk [vmem:[#allocation2 + $0x1f] sm:$0xff] %vm1757_vm11, %v1666_v33 }
 0x1a1   : > { %v1507_v36 = vpop.permute.xlu0 %1506  ;;  %1723 = vrot.lane.b32.xlu1 %v5583_v7, %s4969_s16  ;;  %v4569_v7 = vpack.c.bf16 %v1833_v4, %v1832_v3  ;;  %s3860_s16 = sshll.u32 %s5044_s13, 12  ;;  %s3539_s13 = scalar_lea.sflag [#allocation5], %s5127_s29 }
 0x1a2   : > { %1600 = vst.msk [vmem:[#allocation2 + $0x28] sm:$0xff] %vm1596_vm9, %v1507_v36  ;;  %s6308_s25 = scalar_lea.hbm %s6365_s9, %s3860_s16 }
 0x1a3   : > { %v1509_v37 = vpop.permute.xlu1 %1508 }
 0x1a4   : > { %1601 = vst.msk [vmem:[#allocation2 + $0x30] sm:$0xff] %vm1596_vm9, %v1509_v37 }
 0x1a5   : > { %v1668_v40 = vpop.permute.xlu0 %1667 }
 0x1a6   : > { %1761 = vst.msk [vmem:[#allocation2 + $0x27] sm:$0xff] %vm1757_vm11, %v1668_v40  ;;  %v5690_v41 = vld [vmem:[#allocation2 + $0x10] sm:$0xff] }
 0x1a7   : > { %4197 = vmatprep.mubr.msk.f32.mxu1 %vm1427_vm1, %v5690_v41  ;;  %v1670_v43 = vpop.permute.xlu1 %1669  ;;  %v5694_v11 = vld [vmem:[#allocation2 + $0x18] sm:$0xff] }
 0x1a8   : > { %1762 = vst.msk [vmem:[#allocation2 + $0x2f] sm:$0xff] %vm1757_vm11, %v1670_v43  ;;  %4198 = vmatmul.mubr.msk.f32.vlgmr.msra.gmra.mrb[0].mxu1 %vm1427_vm1, %v5694_v11 }
 0x1a9   : > { %v1511_v49 = vpop.permute.xlu0 %1510  ;;  %4552 = vmatpush3.bf16.msra.mxu1 %v5602_v14  ;;  %v5755_v14 = vpack.c.bf16 %v3744_v8, %v3743_v61 }
 0x1aa   : > { %1602 = vst.msk [vmem:[#allocation2 + $0x38] sm:$0xff] %vm1596_vm9, %v1511_v49  ;;  %4554 = vmatprep.subr.bf16.mxu1 %v4553_v42 }
 0x1ab   : > { %v1513_v51 = vpop.permute.xlu1 %1512 }
 0x1ac   : > { %1603 = vst.msk [vmem:[#allocation2 + $0x40] sm:$0xff] %vm1596_vm9, %v1513_v51 }
 0x1ad   : > { %v1672_v54 = vpop.permute.xlu0 %1671  ;;  %v5714_v55 = vld [vmem:[#allocation2 + $0x20] sm:$0xff]  ;;  %4556 = vmatpush3.bf16.msra.mxu1 %v4553_v42 }
 0x1ae   : > { %1763 = vst.msk [vmem:[#allocation2 + $0x37] sm:$0xff] %vm1757_vm11, %v1672_v54  ;;  %4200 = vmatprep.mubr.msk.f32.mxu1 %vm1427_vm1, %v5714_v55  ;;  %4558 = vmatprep.subr.bf16.mxu1 %v4557_v50 }
 0x1af   : > { %v1674_v56 = vpop.permute.xlu1 %1673  ;;  %v5719_v57 = vld [vmem:[#allocation2 + $0x28] sm:$0xff] }
 0x1b0   : > { %1764 = vst.msk [vmem:[#allocation2 + $0x3f] sm:$0xff] %vm1757_vm11, %v1674_v56  ;;  %4201 = vmatmul.mubr.msk.f32.gmra.mrb[2].mxu1 %vm1427_vm1, %v5719_v57 }
 0x1b1   : > { %v1515_v0 = vpop.permute.xlu0 %1514  ;;  %4560 = vmatpush3.bf16.msra.mxu1 %v4557_v50 }
 0x1b2   : > { %1604 = vst.msk [vmem:[#allocation2 + $0x48] sm:$0xff] %vm1596_vm9, %v1515_v0  ;;  %4562 = vmatprep.subr.bf16.mxu1 %v4561_v48 }
 0x1b3   : > { %v1517_v2 = vpop.permute.xlu1 %1516 }
 0x1b4   : > { %1605 = vst.msk [vmem:[#allocation2 + $0x50] sm:$0xff] %vm1596_vm9, %v1517_v2 }
 0x1b5   : > { %v1676_v5 = vpop.permute.xlu0 %1675  ;;  %v5738_v6 = vld [vmem:[#allocation2 + $0x30] sm:$0xff]  ;;  %4564 = vmatpush3.bf16.msra.mxu1 %v4561_v48 }
 0x1b6   : > { %1765 = vst.msk [vmem:[#allocation2 + $0x47] sm:$0xff] %vm1757_vm11, %v1676_v5  ;;  %4203 = vmatprep.mubr.msk.f32.mxu1 %vm1427_vm1, %v5738_v6  ;;  %4566 = vmatprep.subr.bf16.mxu1 %v4565_v1 }
 0x1b7   : > { %v1678_v23 = vpop.permute.xlu1 %1677  ;;  %v5743_v35 = vld [vmem:[#allocation2 + $0x38] sm:$0xff] }
 0x1b8   : > { %1766 = vst.msk [vmem:[#allocation2 + $0x4f] sm:$0xff] %vm1757_vm11, %v1678_v23  ;;  %4204 = vmatmul.mubr.msk.f32.gmra.mrb[4].mxu1 %vm1427_vm1, %v5743_v35 }
 0x1b9   : > { %v1519_v13 = vpop.permute.xlu0 %1518  ;;  %4568 = vmatpush3.bf16.msra.mxu1 %v4565_v1 }
 0x1ba   : > { %1606 = vst.msk [vmem:[#allocation2 + $0x58] sm:$0xff] %vm1596_vm9, %v1519_v13  ;;  %4570 = vmatprep.subr.bf16.mxu1 %v4569_v7 }
 0x1bb   : > { %v1521_v15 = vpop.permute.xlu1 %1520 }
 0x1bc   : > { %1607 = vst.msk [vmem:[#allocation2 + $0x60] sm:$0xff] %vm1596_vm9, %v1521_v15 }
 0x1bd   : > { %v1680_v16 = vpop.permute.xlu0 %1679  ;;  %v5758_v17 = vld [vmem:[#allocation2 + $0x40] sm:$0xff]  ;;  %4572 = vmatpush3.bf16.msra.mxu1 %v4569_v7 }
 0x1be   : > { %1767 = vst.msk [vmem:[#allocation2 + $0x57] sm:$0xff] %vm1757_vm11, %v1680_v16  ;;  %4206 = vmatprep.mubr.msk.f32.mxu1 %vm1427_vm1, %v5758_v17  ;;  %4574 = vmatprep.subr.bf16.mxu1 %v5755_v14 }
 0x1bf   : > { %v1682_v34 = vpop.permute.xlu1 %1681  ;;  %v5764_v47 = vld [vmem:[#allocation2 + $0x48] sm:$0xff] }
 0x1c0   : > { %1768 = vst.msk [vmem:[#allocation2 + $0x5f] sm:$0xff] %vm1757_vm11, %v1682_v34  ;;  %4207 = vmatmul.mubr.msk.f32.gmra.mrb[6].mxu1 %vm1427_vm1, %v5764_v47 }
 0x1c1   : > { %v1523_v18 = vpop.permute.xlu0 %1522 }
 0x1c2   : > { %1608 = vst.msk [vmem:[#allocation2 + $0x68] sm:$0xff] %vm1596_vm9, %v1523_v18 }
 0x1c3   : > { %v1525_v62 = vpop.permute.xlu1 %1524 }
 0x1c4   : > { %1609 = vst.msk [vmem:[#allocation2 + $0x70] sm:$0xff] %vm1596_vm9, %v1525_v62 }
 0x1c5   : > { %v1684_v46 = vpop.permute.xlu0 %1683  ;;  %v5771_v60 = vld [vmem:[#allocation2 + $0x50] sm:$0xff] }
 0x1c6   : > { %1769 = vst.msk [vmem:[#allocation2 + $0x67] sm:$0xff] %vm1757_vm11, %v1684_v46  ;;  %4209 = vmatprep.mubr.msk.f32.mxu1 %vm1427_vm1, %v5771_v60 }
 0x1c7   : > { %v1686_v19 = vpop.permute.xlu1 %1685  ;;  %v5776_v59 = vld [vmem:[#allocation2 + $0x58] sm:$0xff] }
 0x1c8   : > { %1770 = vst.msk [vmem:[#allocation2 + $0x6f] sm:$0xff] %vm1757_vm11, %v1686_v19  ;;  %4210 = vmatmul.mubr.msk.f32.gmra.mrb[8].mxu1 %vm1427_vm1, %v5776_v59 }
 0x1c9   : > { %v1527_v10 = vpop.permute.xlu0 %1526 }
 0x1ca   : > { %1610 = vst.msk [vmem:[#allocation2 + $0x78] sm:$0xff] %vm1596_vm9, %v1527_v10 }
 0x1cb   : > { %v1529_v20 = vpop.permute.xlu1 %1528 }
 0x1cc   : > { %1611 = vst.msk [vmem:[#allocation2 + $0x80] sm:$0xff] %vm1596_vm9, %v1529_v20 }
 0x1cd   : > { %v1688_v9 = vpop.permute.xlu0 %1687  ;;  %v5783_v22 = vld [vmem:[#allocation2 + $0x60] sm:$0xff] }
 0x1ce   : > { %1771 = vst.msk [vmem:[#allocation2 + $0x77] sm:$0xff] %vm1757_vm11, %v1688_v9  ;;  %4212 = vmatprep.mubr.msk.f32.mxu1 %vm1427_vm1, %v5783_v22 }
 0x1cf   : > { %v1690_v25 = vpop.permute.xlu1 %1689  ;;  %v5788_v21 = vld [vmem:[#allocation2 + $0x68] sm:$0xff] }
 0x1d0   : > { %1772 = vst.msk [vmem:[#allocation2 + $0x7f] sm:$0xff] %vm1757_vm11, %v1690_v25  ;;  %4213 = vmatmul.mubr.msk.f32.gmra.mrb[10].mxu1 %vm1427_vm1, %v5788_v21 }
 0x1d1   : > { %v1531_v12 = vpop.permute.xlu0 %1530 }
 0x1d2   : > { %1612 = vst.msk [vmem:[#allocation2 + $0x88] sm:$0xff] %vm1596_vm9, %v1531_v12 }
 0x1d3   : > { %v1533_v26 = vpop.permute.xlu1 %1532 }
 0x1d4   : > { %1613 = vst.msk [vmem:[#allocation2 + $0x90] sm:$0xff] %vm1596_vm9, %v1533_v26 }
 0x1d5   : > { %v1692_v27 = vpop.permute.xlu0 %1691  ;;  %v5795_v28 = vld [vmem:[#allocation2 + $0x70] sm:$0xff] }
 0x1d6   : > { %1773 = vst.msk [vmem:[#allocation2 + $0x87] sm:$0xff] %vm1757_vm11, %v1692_v27  ;;  %4215 = vmatprep.mubr.msk.f32.mxu1 %vm1427_vm1, %v5795_v28 }
 0x1d7   : > { %v1694_v29 = vpop.permute.xlu1 %1693  ;;  %v5800_v30 = vld [vmem:[#allocation2 + $0x78] sm:$0xff] }
 0x1d8   : > { %1774 = vst.msk [vmem:[#allocation2 + $0x8f] sm:$0xff] %vm1757_vm11, %v1694_v29  ;;  %4216 = vmatmul.mubr.msk.f32.gmra.mrb[12].mxu1 %vm1427_vm1, %v5800_v30  ;;  %v1790_v29 = vld [vmem:[#allocation2] sm:$0xff] }
 0x1d9   : > { %v1535_v52 = vpop.permute.xlu0 %1534 }
 0x1da   : > { %1614 = vst.msk [vmem:[#allocation2 + $0x98] sm:$0xff] %vm1596_vm9, %v1535_v52  ;;  %v3745_v52 = vld [vmem:[%s6359_s3 + $0xd0] sm:$0xff] }
 0x1db   : > { %v1537_v31 = vpop.permute.xlu1 %1536 }
 0x1dc   : > { %1615 = vst.msk [vmem:[#allocation2 + $0xa0] sm:$0xff] %vm1596_vm9, %v1537_v31  ;;  %v3746_v31 = vld [vmem:[%s6359_s3 + $0xd8] sm:$0xff] }
 0x1dd   : > { %v1696_v32 = vpop.permute.xlu0 %1695  ;;  %v5807_v33 = vld [vmem:[#allocation2 + $0x80] sm:$0xff] }
 0x1de   : > { %1775 = vst.msk [vmem:[#allocation2 + $0x97] sm:$0xff] %vm1757_vm11, %v1696_v32  ;;  %4218 = vmatprep.mubr.msk.f32.mxu1 %vm1427_vm1, %v5807_v33  ;;  %v2870_v32 = vld [vmem:[%s6361_s5] sm:$0xff] }
 0x1df   : > { %v1698_v36 = vpop.permute.xlu1 %1697  ;;  %v5812_v37 = vld [vmem:[#allocation2 + $0x88] sm:$0xff] }
 0x1e0   : > { %1776 = vst.msk [vmem:[#allocation2 + $0x9f] sm:$0xff] %vm1757_vm11, %v1698_v36  ;;  %4219 = vmatmul.mubr.msk.f32.gmra.mrb[14].mxu1 %vm1427_vm1, %v5812_v37  ;;  %v2871_v36 = vld [vmem:[%s6361_s5 + $0x8] sm:$0xff] }
 0x1e1   : > { %v1539_v38 = vpop.permute.xlu0 %1538 }
 0x1e2   : > { %1616 = vst.msk [vmem:[#allocation2 + $0xa8] sm:$0xff] %vm1596_vm9, %v1539_v38  ;;  %v2872_v38 = vld [vmem:[%s6361_s5 + $0x10] sm:$0xff] }
 0x1e3   : > { %v1541_v39 = vpop.permute.xlu1 %1540 }
 0x1e4   : > { %1617 = vst.msk [vmem:[#allocation2 + $0xb0] sm:$0xff] %vm1596_vm9, %v1541_v39  ;;  %v4597_v39 = vpack.c.bf16 %v2871_v36, %v2870_v32 }
 0x1e5   : > { %v1700_v40 = vpop.permute.xlu0 %1699  ;;  %v5819_v42 = vld [vmem:[#allocation2 + $0x90] sm:$0xff] }
 0x1e6   : > { %1777 = vst.msk [vmem:[#allocation2 + $0xa7] sm:$0xff] %vm1757_vm11, %v1700_v40  ;;  %4221 = vmatprep.mubr.msk.f32.mxu1 %vm1427_vm1, %v5819_v42  ;;  %v2873_v40 = vld [vmem:[%s6361_s5 + $0x18] sm:$0xff]  ;;  %4598 = vmatprep.subr.bf16.mxu0 %v4597_v39 }
 0x1e7   : > { %v1702_v43 = vpop.permute.xlu1 %1701  ;;  %v5824_v44 = vld [vmem:[#allocation2 + $0x98] sm:$0xff]  ;;  %4600 = vmatpush3.bf16.msra.mxu0 %v4597_v39 }
 0x1e8   : > { %1778 = vst.msk [vmem:[#allocation2 + $0xaf] sm:$0xff] %vm1757_vm11, %v1702_v43  ;;  %4222 = vmatmul.mubr.msk.f32.gmra.mrb[16].mxu1 %vm1427_vm1, %v5824_v44  ;;  %v4577_v43 = vpack.c.bf16 %v3746_v31, %v3745_v52 }
 0x1e9   : > { %v1543_v45 = vpop.permute.xlu0 %1542 }
 0x1ea   : > { %1618 = vst.msk [vmem:[#allocation2 + $0xb8] sm:$0xff] %vm1596_vm9, %v1543_v45  ;;  %v4601_v45 = vpack.c.bf16 %v2873_v40, %v2872_v38 }
 0x1eb   : > { %v1545_v49 = vpop.permute.xlu1 %1544 }
 0x1ec   : > { %1619 = vst.msk [vmem:[#allocation2 + $0xc0] sm:$0xff] %vm1596_vm9, %v1545_v49  ;;  %v1791_v49 = vld [vmem:[#allocation2 + $0x8] sm:$0xff]  ;;  %4602 = vmatprep.subr.bf16.mxu0 %v4601_v45 }
 0x1ed   : > { %v1704_v50 = vpop.permute.xlu0 %1703  ;;  %v5831_v51 = vld [vmem:[#allocation2 + $0xa0] sm:$0xff]  ;;  %4604 = vmatpush3.bf16.msra.mxu0 %v4601_v45 }
 0x1ee   : > { %1779 = vst.msk [vmem:[#allocation2 + $0xb7] sm:$0xff] %vm1757_vm11, %v1704_v50  ;;  %4224 = vmatprep.mubr.msk.f32.mxu1 %vm1427_vm1, %v5831_v51  ;;  %v3747_v50 = vld [vmem:[%s6359_s3 + $0xe0] sm:$0xff] }
 0x1ef   : > { %v1706_v53 = vpop.permute.xlu1 %1705  ;;  %v5836_v24 = vld [vmem:[#allocation2 + $0xa8] sm:$0xff] }
 0x1f0   : > { %1780 = vst.msk [vmem:[#allocation2 + $0xbf] sm:$0xff] %vm1757_vm11, %v1706_v53  ;;  %4225 = vmatmul.mubr.msk.f32.gmra.mrb[18].mxu1 %vm1427_vm1, %v5836_v24  ;;  %v3748_v53 = vld [vmem:[%s6359_s3 + $0xe8] sm:$0xff] }
 0x1f1   : > { %v1547_v54 = vpop.permute.xlu0 %1546 }
 0x1f2   : > { %1620 = vst.msk [vmem:[#allocation2 + $0xc8] sm:$0xff] %vm1596_vm9, %v1547_v54  ;;  %v4581_v54 = vpack.c.bf16 %v3748_v53, %v3747_v50 }
 0x1f3   : > { %v1549_v48 = vpop.permute.xlu1 %1548 }
 0x1f4   : > { %1621 = vst.msk [vmem:[#allocation2 + $0xd0] sm:$0xff] %vm1596_vm9, %v1549_v48  ;;  %v3749_v48 = vld [vmem:[%s6359_s3 + $0xf0] sm:$0xff] }
 0x1f5   : > { %v1708_v56 = vpop.permute.xlu0 %1707  ;;  %v5843_v58 = vld [vmem:[#allocation2 + $0xb0] sm:$0xff] }
 0x1f6   : > { %1781 = vst.msk [vmem:[#allocation2 + $0xc7] sm:$0xff] %vm1757_vm11, %v1708_v56  ;;  %4227 = vmatprep.mubr.msk.f32.mxu1 %vm1427_vm1, %v5843_v58  ;;  %v3750_v56 = vld [vmem:[%s6359_s3 + $0xf8] sm:$0xff] }
 0x1f7   : > { %v1710_v63 = vpop.permute.xlu1 %1709  ;;  %v5848_v0 = vld [vmem:[#allocation2 + $0xb8] sm:$0xff] }
 0x1f8   : > { %1782 = vst.msk [vmem:[#allocation2 + $0xcf] sm:$0xff] %vm1757_vm11, %v1710_v63  ;;  %4228 = vmatmul.mubr.msk.f32.gmra.mrb[20].mxu1 %vm1427_vm1, %v5848_v0  ;;  %v3752_v63 = vld [vmem:[%s6359_s3 + $0x108] sm:$0xff] }
 0x1f9   : > { %v1551_v1 = vpop.permute.xlu0 %1550 }
 0x1fa   : > { %1622 = vst.msk [vmem:[#allocation2 + $0xd8] sm:$0xff] %vm1596_vm9, %v1551_v1  ;;  %v3753_v1 = vld [vmem:[%s6359_s3 + $0x110] sm:$0xff] }
 0x1fb   : > { %v1553_v2 = vpop.permute.xlu1 %1552 }
 0x1fc   : > { %1623 = vst.msk [vmem:[#allocation2 + $0xe0] sm:$0xff] %vm1596_vm9, %v1553_v2  ;;  %v3754_v2 = vld [vmem:[%s6359_s3 + $0x118] sm:$0xff] }
 0x1fd   : > { %v1712_v3 = vpop.permute.xlu0 %1711  ;;  %v5855_v4 = vld [vmem:[#allocation2 + $0xc0] sm:$0xff] }
 0x1fe   : > { %1783 = vst.msk [vmem:[#allocation2 + $0xd7] sm:$0xff] %vm1757_vm11, %v1712_v3  ;;  %4230 = vmatprep.mubr.msk.f32.mxu1 %vm1427_vm1, %v5855_v4  ;;  %v4593_v3 = vpack.c.bf16 %v3754_v2, %v3753_v1 }
 0x1ff   : > { %v1714_v5 = vpop.permute.xlu1 %1713  ;;  %v5860_v7 = vld [vmem:[#allocation2 + $0xc8] sm:$0xff] }
 0x200   : > { %1784 = vst.msk [vmem:[#allocation2 + $0xdf] sm:$0xff] %vm1757_vm11, %v1714_v5  ;;  %4231 = vmatmul.mubr.msk.f32.gmra.mrb[22].mxu1 %vm1427_vm1, %v5860_v7 }
 0x201   : > { %v1555_v23 = vpop.permute.xlu0 %1554 }
 0x202   : > { %1624 = vst.msk [vmem:[#allocation2 + $0xe8] sm:$0xff] %vm1596_vm9, %v1555_v23 }
 0x203   : > { %v1557_v61 = vpop.permute.xlu1 %1556 }
 0x204   : > { %1625 = vst.msk [vmem:[#allocation2 + $0xf0] sm:$0xff] %vm1596_vm9, %v1557_v61 }
 0x205   : > { %v1716_v8 = vpop.permute.xlu0 %1715  ;;  %v5867_v13 = vld [vmem:[#allocation2 + $0xd0] sm:$0xff] }
 0x206   : > { %1785 = vst.msk [vmem:[#allocation2 + $0xe7] sm:$0xff] %vm1757_vm11, %v1716_v8  ;;  %4233 = vmatprep.mubr.msk.f32.mxu1 %vm1427_vm1, %v5867_v13 }
 0x207   : > { %v1718_v15 = vpop.permute.xlu1 %1717  ;;  %v5872_v16 = vld [vmem:[#allocation2 + $0xd8] sm:$0xff] }
 0x208   : > { %1786 = vst.msk [vmem:[#allocation2 + $0xef] sm:$0xff] %vm1757_vm11, %v1718_v15  ;;  %4234 = vmatmul.mubr.msk.f32.gmra.mrb[24].mxu1 %vm1427_vm1, %v5872_v16 }
 0x209   : > { %v1559_v34 = vpop.permute.xlu0 %1558 }
 0x20a   : > { %1626 = vst.msk [vmem:[#allocation2 + $0xf8] sm:$0xff] %vm1596_vm9, %v1559_v34  ;;  %v3209_v34 = vld [vmem:[%s6363_s7 + $0x38] sm:$0xff] }
 0x20b   : > { %v1561_v18 = vpop.permute.xlu1 %1560 }
 0x20c   : > { %1627 = vst.msk [vmem:[#allocation2 + $0x100] sm:$0xff] %vm1596_vm9, %v1561_v18 }
 0x20d   : > { %v1720_v62 = vpop.permute.xlu0 %1719  ;;  %v5879_v46 = vld [vmem:[#allocation2 + $0xe0] sm:$0xff] }
 0x20e   : > { %1787 = vst.msk [vmem:[#allocation2 + $0xf7] sm:$0xff] %vm1757_vm11, %v1720_v62  ;;  %4236 = vmatprep.mubr.msk.f32.mxu1 %vm1427_vm1, %v5879_v46 }
 0x20f   : > { %v1722_v19 = vpop.permute.xlu1 %1721  ;;  %v5884_v10 = vld [vmem:[#allocation2 + $0xe8] sm:$0xff] }
 0x210   : > { %1788 = vst.msk [vmem:[#allocation2 + $0xff] sm:$0xff] %vm1757_vm11, %v1722_v19  ;;  %4237 = vmatmul.mubr.msk.f32.gmra.mrb[26].mxu1 %vm1427_vm1, %v5884_v10 }
 0x211   : > { %v1563_v20 = vpop.permute.xlu0 %1562 }
 0x212   : > { %1628 = vst.msk [vmem:[#allocation2 + $0x108] sm:$0xff] %vm1596_vm9, %v1563_v20 }
 0x213   : > { %v1724_v9 = vpop.permute.xlu1 %1723 }
 0x214   : > { %1789 = vst.msk [vmem:[#allocation2 + $0x107] sm:$0xff] %vm1757_vm11, %v1724_v9 }
 0x215   : > { %v5891_v25 = vld [vmem:[#allocation2 + $0xf0] sm:$0xff] }
 0x216   : > { %4239 = vmatprep.mubr.msk.f32.mxu1 %vm1427_vm1, %v5891_v25 }
 0x217   : > { %v5895_v12 = vld [vmem:[#allocation2 + $0xf8] sm:$0xff] }
 0x218   : > { %4240 = vmatmul.mubr.msk.f32.gmra.mrb[28].mxu1 %vm1427_vm1, %v5895_v12 }
 0x21b   : > { %v5899_v26 = vld [vmem:[#allocation2 + $0x100] sm:$0xff]  ;;  %v5901_v27 = vld [vmem:[#allocation2 + $0x108] sm:$0xff] }
 0x21c   : > { %4242 = vmatprep.mubr.msk.f32.mxu1 %vm1427_vm1, %v5899_v26 }
 0x21d   : > { %4243 = vmatmul.mubr.msk.f32.gmra.mrb[30].mxu1 %vm1427_vm1, %v5901_v27 }
 0x21e   : > { %4269 = vmatprep.mubr.msk.f32.mxu1 %vm1427_vm1, %v1790_v29 }
 0x221   : > { %4270 = vmatmul.mubr.msk.f32.vlgmr.msra.gmra.mrb[0].mxu1 %vm1427_vm1, %v1791_v49 }
 0x222   : > { %4576 = vmatpush3.bf16.msra.mxu1 %v5755_v14  ;;  %4272 = vmatprep.mubr.msk.f32.mxu1 %vm1427_vm1, %v5690_v41  ;;  %v4585_v41 = vpack.c.bf16 %v3750_v56, %v3749_v48  ;;  %v3751_v14 = vld [vmem:[%s6359_s3 + $0x100] sm:$0xff] }
 0x223   : > { %4578 = vmatprep.subr.bf16.mxu1 %v4577_v43 }
 0x225   : > { %4273 = vmatmul.mubr.msk.f32.gmra.mrb[2].mxu1 %vm1427_vm1, %v5694_v11  ;;  %v4589_v11 = vpack.c.bf16 %v3752_v63, %v3751_v14 }
 0x226   : > { %4275 = vmatprep.mubr.msk.f32.mxu1 %vm1427_vm1, %v5714_v55  ;;  %4580 = vmatpush3.bf16.msra.mxu1 %v4577_v43 }
 0x227   : > { %4582 = vmatprep.subr.bf16.mxu1 %v4581_v54 }
 0x229   : > { %4276 = vmatmul.mubr.msk.f32.gmra.mrb[4].mxu1 %vm1427_vm1, %v5719_v57 }
 0x22a   : > { %4278 = vmatprep.mubr.msk.f32.mxu1 %vm1427_vm1, %v5738_v6  ;;  %4584 = vmatpush3.bf16.msra.mxu1 %v4581_v54 }
 0x22b   : > { %4586 = vmatprep.subr.bf16.mxu1 %v4585_v41 }
 0x22d   : > { %4279 = vmatmul.mubr.msk.f32.gmra.mrb[6].mxu1 %vm1427_vm1, %v5743_v35 }
 0x22e   : > { %4281 = vmatprep.mubr.msk.f32.mxu1 %vm1427_vm1, %v5758_v17  ;;  %4588 = vmatpush3.bf16.msra.mxu1 %v4585_v41 }
 0x22f   : > { %4590 = vmatprep.subr.bf16.mxu1 %v4589_v11 }
 0x231   : > { %4282 = vmatmul.mubr.msk.f32.gmra.mrb[8].mxu1 %vm1427_vm1, %v5764_v47 }
 0x232   : > { %4284 = vmatprep.mubr.msk.f32.mxu1 %vm1427_vm1, %v5771_v60  ;;  %4592 = vmatpush3.bf16.msra.mxu1 %v4589_v11 }
 0x233   : > { %4594 = vmatprep.subr.bf16.mxu1 %v4593_v3 }
 0x235   : > { %4285 = vmatmul.mubr.msk.f32.gmra.mrb[10].mxu1 %vm1427_vm1, %v5776_v59 }
 0x236   : > { %4287 = vmatprep.mubr.msk.f32.mxu1 %vm1427_vm1, %v5783_v22  ;;  %4596 = vmatpush3.bf16.msra.mxu1 %v4593_v3 }
 0x239   : > { %4288 = vmatmul.mubr.msk.f32.gmra.mrb[12].mxu1 %vm1427_vm1, %v5788_v21 }
 0x23a   : > { %4290 = vmatprep.mubr.msk.f32.mxu1 %vm1427_vm1, %v5795_v28 }
 0x23d   : > { %4291 = vmatmul.mubr.msk.f32.gmra.mrb[14].mxu1 %vm1427_vm1, %v5800_v30 }
 0x23e   : > { %4293 = vmatprep.mubr.msk.f32.mxu1 %vm1427_vm1, %v5807_v33 }
 0x241   : > { %4294 = vmatmul.mubr.msk.f32.gmra.mrb[16].mxu1 %vm1427_vm1, %v5812_v37 }
 0x242   : > { %4296 = vmatprep.mubr.msk.f32.mxu1 %vm1427_vm1, %v5819_v42 }
 0x245   : > { %4297 = vmatmul.mubr.msk.f32.gmra.mrb[18].mxu1 %vm1427_vm1, %v5824_v44 }
 0x246   : > { %4299 = vmatprep.mubr.msk.f32.mxu1 %vm1427_vm1, %v5831_v51 }
 0x249   : > { %4300 = vmatmul.mubr.msk.f32.gmra.mrb[20].mxu1 %vm1427_vm1, %v5836_v24 }
 0x24a   : > { %4302 = vmatprep.mubr.msk.f32.mxu1 %vm1427_vm1, %v5843_v58 }
 0x24d   : > { %4303 = vmatmul.mubr.msk.f32.gmra.mrb[22].mxu1 %vm1427_vm1, %v5848_v0 }
 0x24e   : > { %4305 = vmatprep.mubr.msk.f32.mxu1 %vm1427_vm1, %v5855_v4 }
 0x251   : > { %4306 = vmatmul.mubr.msk.f32.gmra.mrb[24].mxu1 %vm1427_vm1, %v5860_v7 }
 0x252   : > { %4308 = vmatprep.mubr.msk.f32.mxu1 %vm1427_vm1, %v5867_v13 }
 0x255   : > { %4309 = vmatmul.mubr.msk.f32.gmra.mrb[26].mxu1 %vm1427_vm1, %v5872_v16 }
 0x256   : > { %4311 = vmatprep.mubr.msk.f32.mxu1 %vm1427_vm1, %v5879_v46 }
 0x259   : > { %4312 = vmatmul.mubr.msk.f32.gmra.mrb[28].mxu1 %vm1427_vm1, %v5884_v10 }
 0x25a   : > { %4314 = vmatprep.mubr.msk.f32.mxu1 %vm1427_vm1, %v5891_v25 }
 0x25d   : > { %4315 = vmatmul.mubr.msk.f32.gmra.mrb[30].mxu1 %vm1427_vm1, %v5895_v12 }
 0x25e   : > { %4341 = vmatprep.mubr.msk.f32.mxu1 %vm1427_vm1, %v5714_v55  ;;  %v2431_v55 = vld [vmem:[#allocation2 + $0x110] sm:$0xff] }
 0x261   : > { %4342 = vmatmul.mubr.msk.f32.vlgmr.msra.gmra.mrb[0].mxu1 %vm1427_vm1, %v5719_v57  ;;  %v2432_v57 = vld [vmem:[#allocation2 + $0x118] sm:$0xff] }
 0x262   : > { %4344 = vmatprep.mubr.msk.f32.mxu1 %vm1427_vm1, %v5738_v6  ;;  %v3202_v6 = vld [vmem:[%s6363_s7] sm:$0xff] }
 0x265   : > { %4345 = vmatmul.mubr.msk.f32.gmra.mrb[2].mxu1 %vm1427_vm1, %v5743_v35  ;;  %v3203_v35 = vld [vmem:[%s6363_s7 + $0x8] sm:$0xff] }
 0x266   : > { %4347 = vmatprep.mubr.msk.f32.mxu1 %vm1427_vm1, %v5758_v17  ;;  %v4605_v17 = vpack.c.bf16 %v3203_v35, %v3202_v6 }
 0x268   : > { %4606 = vmatprep.subr.bf16.mxu0 %v4605_v17 }
 0x269   : > { %4348 = vmatmul.mubr.msk.f32.gmra.mrb[4].mxu1 %vm1427_vm1, %v5764_v47  ;;  %v6083_v47 = vld [vmem:[%s6360_s4] ss:$0 sm:$0xff] }
 0x26a   : > { %4350 = vmatprep.mubr.msk.f32.mxu1 %vm1427_vm1, %v5771_v60 }
 0x26d   : > { %4351 = vmatmul.mubr.msk.f32.gmra.mrb[6].mxu1 %vm1427_vm1, %v5776_v59 }
 0x26e   : > { %4353 = vmatprep.mubr.msk.f32.mxu1 %vm1427_vm1, %v5783_v22 }
 0x271   : > { %4354 = vmatmul.mubr.msk.f32.gmra.mrb[8].mxu1 %vm1427_vm1, %v5788_v21 }
 0x272   : > { %4356 = vmatprep.mubr.msk.f32.mxu1 %vm1427_vm1, %v5795_v28  ;;  %v3204_v28 = vld [vmem:[%s6363_s7 + $0x10] sm:$0xff] }
 0x275   : > { %4357 = vmatmul.mubr.msk.f32.gmra.mrb[10].mxu1 %vm1427_vm1, %v5800_v30  ;;  %v3205_v30 = vld [vmem:[%s6363_s7 + $0x18] sm:$0xff] }
 0x276   : > { %4359 = vmatprep.mubr.msk.f32.mxu1 %vm1427_vm1, %v5807_v33 }
 0x279   : > { %4360 = vmatmul.mubr.msk.f32.gmra.mrb[12].mxu1 %vm1427_vm1, %v5812_v37 }
 0x27a   : > { %4362 = vmatprep.mubr.msk.f32.mxu1 %vm1427_vm1, %v5819_v42 }
 0x27d   : > { %4363 = vmatmul.mubr.msk.f32.gmra.mrb[14].mxu1 %vm1427_vm1, %v5824_v44 }
 0x27e   : > { %4365 = vmatprep.mubr.msk.f32.mxu1 %vm1427_vm1, %v5831_v51 }
 0x281   : > { %4366 = vmatmul.mubr.msk.f32.gmra.mrb[16].mxu1 %vm1427_vm1, %v5836_v24  ;;  %v4609_v24 = vpack.c.bf16 %v3205_v30, %v3204_v28 }
 0x282   : > { %4368 = vmatprep.mubr.msk.f32.mxu1 %vm1427_vm1, %v5843_v58 }
 0x285   : > { %4369 = vmatmul.mubr.msk.f32.gmra.mrb[18].mxu1 %vm1427_vm1, %v5848_v0  ;;  %v3206_v0 = vld [vmem:[%s6363_s7 + $0x20] sm:$0xff] }
 0x286   : > { %4371 = vmatprep.mubr.msk.f32.mxu1 %vm1427_vm1, %v5855_v4  ;;  %v3207_v4 = vld [vmem:[%s6363_s7 + $0x28] sm:$0xff] }
 0x289   : > { %4372 = vmatmul.mubr.msk.f32.gmra.mrb[20].mxu1 %vm1427_vm1, %v5860_v7 }
 0x28a   : > { %4374 = vmatprep.mubr.msk.f32.mxu1 %vm1427_vm1, %v5867_v13  ;;  %v4613_v13 = vpack.c.bf16 %v3207_v4, %v3206_v0 }
 0x28d   : > { %4375 = vmatmul.mubr.msk.f32.gmra.mrb[22].mxu1 %vm1427_vm1, %v5872_v16  ;;  %v3208_v16 = vld [vmem:[%s6363_s7 + $0x30] sm:$0xff] }
 0x28e   : > { %4377 = vmatprep.mubr.msk.f32.mxu1 %vm1427_vm1, %v5879_v46  ;;  %v4617_v20 = vpack.c.bf16 %v3209_v34, %v3208_v16 }
 0x291   : > { %4378 = vmatmul.mubr.msk.f32.gmra.mrb[24].mxu1 %vm1427_vm1, %v5884_v10 }
 0x292   : > { %4380 = vmatprep.mubr.msk.f32.mxu1 %vm1427_vm1, %v5891_v25 }
 0x295   : > { %4381 = vmatmul.mubr.msk.f32.gmra.mrb[26].mxu1 %vm1427_vm1, %v5895_v12 }
 0x296   : > { %4383 = vmatprep.mubr.msk.f32.mxu1 %vm1427_vm1, %v5899_v26 }
 0x299   : > { %4384 = vmatmul.mubr.msk.f32.gmra.mrb[28].mxu1 %vm1427_vm1, %v5901_v27 }
 0x29a   : > { %4386 = vmatprep.mubr.msk.f32.mxu1 %vm1427_vm1, %v2431_v55 }
 0x29d   : > { %4387 = vmatmul.mubr.msk.f32.gmra.mrb[30].mxu1 %vm1427_vm1, %v2432_v57 }
 0x334   : > { %v4343_v60 = vpop.f32.mrb[0].mxu1 }
 0x335   : > { %v2807_v59 = vadd.f32 %v4343_v60, %v6083_v47  ;;  %v2608_v22 = vpop.f32.mrb[1].mxu1 }
 0x336   : > { %v2806_v21 = vadd.f32 %v6083_v47, %v2608_v22 }
 0x337   : > { %v2839_v42 = vmax.f32 %v2807_v59, 0.0 }
 0x338   : > { %v2838_v33 = vmax.f32 %v2806_v21, 0.0  ;;  %v4346_v37 = vpop.f32.mrb[2].mxu1 }
 0x339   : > { %v2809_v44 = vadd.f32 %v4346_v37, %v6083_v47  ;;  %v2618_v51 = vpop.f32.mrb[3].mxu1 }
 0x33a   : > { %v2808_v58 = vadd.f32 %v6083_v47, %v2618_v51  ;;  %4397 = vmatprep.mubr.msk.f32.mxu0 %vm1435_vm4, %v2838_v33 }
 0x33b   : > { %4398 = vmatmul.mubr.msk.f32.vlgmr.msra.gmra.mrb[32].mxu0 %vm1435_vm4, %v2839_v42  ;;  %v2841_v23 = vmax.f32 %v2809_v44, 0.0 }
 0x33c   : > { %v2840_v5 = vmax.f32 %v2808_v58, 0.0  ;;  %4608 = vmatpush3.bf16.msra.mxu0 %v4605_v17  ;;  %v4349_v7 = vpop.f32.mrb[4].mxu1 }
 0x33d   : > { %v2811_v61 = vadd.f32 %v4349_v7, %v6083_v47  ;;  %v2628_v8 = vpop.f32.mrb[5].mxu1  ;;  %4610 = vmatprep.subr.bf16.mxu0 %v4609_v24 }
 0x33e   : > { %v2810_v15 = vadd.f32 %v6083_v47, %v2628_v8  ;;  %4400 = vmatprep.mubr.msk.f32.mxu0 %vm1435_vm4, %v2840_v5 }
 0x33f   : > { %4401 = vmatmul.mubr.msk.f32.gmra.mrb[34].mxu0 %vm1435_vm4, %v2841_v23  ;;  %v2843_v46 = vmax.f32 %v2811_v61, 0.0 }
 0x340   : > { %v2842_v18 = vmax.f32 %v2810_v15, 0.0  ;;  %v4352_v62 = vpop.f32.mrb[6].mxu1  ;;  %4612 = vmatpush3.bf16.msra.mxu0 %v4609_v24 }
 0x341   : > { %v2813_v19 = vadd.f32 %v4352_v62, %v6083_v47  ;;  %v2638_v10 = vpop.f32.mrb[7].mxu1  ;;  %4614 = vmatprep.subr.bf16.mxu0 %v4613_v13 }
 0x342   : > { %v2812_v9 = vadd.f32 %v6083_v47, %v2638_v10  ;;  %4403 = vmatprep.mubr.msk.f32.mxu0 %vm1435_vm4, %v2842_v18 }
 0x343   : > { %4404 = vmatmul.mubr.msk.f32.gmra.mrb[36].mxu0 %vm1435_vm4, %v2843_v46  ;;  %v2845_v26 = vmax.f32 %v2813_v19, 0.0 }
 0x344   : > { %v2844_v25 = vmax.f32 %v2812_v9, 0.0  ;;  %v4355_v12 = vpop.f32.mrb[8].mxu1  ;;  %4616 = vmatpush3.bf16.msra.mxu0 %v4613_v13 }
 0x345   : > { %v2815_v27 = vadd.f32 %v4355_v12, %v6083_v47  ;;  %v2648_v29 = vpop.f32.mrb[9].mxu1  ;;  %4618 = vmatprep.subr.bf16.mxu0 %v4617_v20 }
 0x346   : > { %v2814_v52 = vadd.f32 %v6083_v47, %v2648_v29  ;;  %4406 = vmatprep.mubr.msk.f32.mxu0 %vm1435_vm4, %v2844_v25 }
 0x347   : > { %4407 = vmatmul.mubr.msk.f32.gmra.mrb[38].mxu0 %vm1435_vm4, %v2845_v26  ;;  %v2847_v36 = vmax.f32 %v2815_v27, 0.0 }
 0x348   : > { %v2846_v31 = vmax.f32 %v2814_v52, 0.0  ;;  %v4358_v32 = vpop.f32.mrb[10].mxu1  ;;  %4620 = vmatpush3.bf16.msra.mxu0 %v4617_v20 }
 0x349   : > { %v2817_v38 = vadd.f32 %v4358_v32, %v6083_v47  ;;  %v2658_v39 = vpop.f32.mrb[11].mxu1 }
 0x34a   : > { %v2816_v40 = vadd.f32 %v6083_v47, %v2658_v39  ;;  %4409 = vmatprep.mubr.msk.f32.mxu0 %vm1435_vm4, %v2846_v31 }
 0x34b   : > { %4410 = vmatmul.mubr.msk.f32.gmra.mrb[40].mxu0 %vm1435_vm4, %v2847_v36  ;;  %v2849_v49 = vmax.f32 %v2817_v38, 0.0 }
 0x34c   : > { %v2848_v43 = vmax.f32 %v2816_v40, 0.0  ;;  %v4361_v45 = vpop.f32.mrb[12].mxu1  ;;  %v4834_v40 = vld [vmem:[%s5133_s19] sm:$0xff] }
 0x34d   : > { %v2819_v50 = vadd.f32 %v4361_v45, %v6083_v47  ;;  %v2668_v53 = vpop.f32.mrb[13].mxu1  ;;  %v4837_v45 = vld [vmem:[%s5133_s19 + $0x18] sm:$0xff] }
 0x34e   : > { %v2818_v54 = vadd.f32 %v6083_v47, %v2668_v53  ;;  %4412 = vmatprep.mubr.msk.f32.mxu0 %vm1435_vm4, %v2848_v43  ;;  %v4835_v43 = vld [vmem:[%s5133_s19 + $0x8] sm:$0xff]  ;;  %v4840_v53 = vld [vmem:[%s5133_s19 + $0x30] sm:$0xff] }
 0x34f   : > { %4413 = vmatmul.mubr.msk.f32.gmra.mrb[42].mxu0 %vm1435_vm4, %v2849_v49  ;;  %v2851_v41 = vmax.f32 %v2819_v50, 0.0  ;;  %v4838_v49 = vld [vmem:[%s5133_s19 + $0x20] sm:$0xff]  ;;  %v4839_v50 = vld [vmem:[%s5133_s19 + $0x28] sm:$0xff] }
 0x350   : > { %v2850_v48 = vmax.f32 %v2818_v54, 0.0  ;;  %v4364_v56 = vpop.f32.mrb[14].mxu1  ;;  %v4841_v54 = vld [vmem:[%s5133_s19 + $0x38] sm:$0xff] }
 0x351   : > { %v2821_v14 = vadd.f32 %v4364_v56, %v6083_v47  ;;  %v2678_v63 = vpop.f32.mrb[15].mxu1  ;;  %v4843_v56 = vld [vmem:[%s5133_s19 + $0x48] sm:$0xff] }
 0x352   : > { %v2820_v11 = vadd.f32 %v6083_v47, %v2678_v63  ;;  %4415 = vmatprep.mubr.msk.f32.mxu0 %vm1435_vm4, %v2850_v48  ;;  %v4842_v48 = vld [vmem:[%s5133_s19 + $0x40] sm:$0xff] }
 0x353   : > { %4416 = vmatmul.mubr.msk.f32.gmra.mrb[44].mxu0 %vm1435_vm4, %v2851_v41  ;;  %v2853_v3 = vmax.f32 %v2821_v14, 0.0  ;;  %v4844_v41 = vld [vmem:[%s5133_s19 + $0x50] sm:$0xff]  ;;  %v4845_v14 = vld [vmem:[%s5133_s19 + $0x58] sm:$0xff]  ;;  %v4846_v63 = vld [vmem:[%s5133_s19 + $0x60] sm:$0xff] }
 0x354   : > { %v2852_v1 = vmax.f32 %v2820_v11, 0.0  ;;  %v4367_v2 = vpop.f32.mrb[16].mxu1  ;;  %v4847_v11 = vld [vmem:[%s5133_s19 + $0x68] sm:$0xff] }
 0x355   : > { %v2823_v55 = vadd.f32 %v4367_v2, %v6083_v47  ;;  %v2688_v57 = vpop.f32.mrb[17].mxu1  ;;  %v4849_v2 = vld [vmem:[%s5133_s19 + $0x78] sm:$0xff] }
 0x356   : > { %v2822_v6 = vadd.f32 %v6083_v47, %v2688_v57  ;;  %4418 = vmatprep.mubr.msk.f32.mxu0 %vm1435_vm4, %v2852_v1  ;;  %v4848_v1 = vld [vmem:[%s5133_s19 + $0x70] sm:$0xff] }
 0x357   : > { %4419 = vmatmul.mubr.msk.f32.gmra.mrb[46].mxu0 %vm1435_vm4, %v2853_v3  ;;  %v2855_v60 = vmax.f32 %v2823_v55, 0.0  ;;  %v4850_v3 = vld [vmem:[%s5133_s19 + $0x80] sm:$0xff]  ;;  %v4851_v55 = vld [vmem:[%s5133_s19 + $0x88] sm:$0xff]  ;;  %v4852_v57 = vld [vmem:[%s5133_s19 + $0x90] sm:$0xff] }
 0x358   : > { %v2854_v35 = vmax.f32 %v2822_v6, 0.0  ;;  %v4370_v17 = vpop.f32.mrb[18].mxu1  ;;  %v4853_v6 = vld [vmem:[%s5133_s19 + $0x98] sm:$0xff] }
 0x359   : > { %v2825_v59 = vadd.f32 %v4370_v17, %v6083_v47  ;;  %v2698_v22 = vpop.f32.mrb[19].mxu1  ;;  %v4855_v17 = vld [vmem:[%s5133_s19 + $0xa8] sm:$0xff] }
 0x35a   : > { %v2824_v21 = vadd.f32 %v6083_v47, %v2698_v22  ;;  %4421 = vmatprep.mubr.msk.f32.mxu0 %vm1435_vm4, %v2854_v35  ;;  %v4854_v35 = vld [vmem:[%s5133_s19 + $0xa0] sm:$0xff] }
 0x35b   : > { %4422 = vmatmul.mubr.msk.f32.gmra.mrb[48].mxu0 %vm1435_vm4, %v2855_v60  ;;  %v2857_v33 = vmax.f32 %v2825_v59, 0.0  ;;  %v4856_v60 = vld [vmem:[%s5133_s19 + $0xb0] sm:$0xff]  ;;  %v4857_v59 = vld [vmem:[%s5133_s19 + $0xb8] sm:$0xff]  ;;  %v4858_v22 = vld [vmem:[%s5133_s19 + $0xc0] sm:$0xff] }
 0x35c   : > { %v2856_v28 = vmax.f32 %v2824_v21, 0.0  ;;  %v4373_v30 = vpop.f32.mrb[20].mxu1  ;;  %v4859_v21 = vld [vmem:[%s5133_s19 + $0xc8] sm:$0xff] }
 0x35d   : > { %v2827_v37 = vadd.f32 %v4373_v30, %v6083_v47  ;;  %v2708_v42 = vpop.f32.mrb[21].mxu1  ;;  %v4861_v30 = vld [vmem:[%s5133_s19 + $0xd8] sm:$0xff] }
 0x35e   : > { %v2826_v44 = vadd.f32 %v6083_v47, %v2708_v42  ;;  %4424 = vmatprep.mubr.msk.f32.mxu0 %vm1435_vm4, %v2856_v28  ;;  %v4860_v28 = vld [vmem:[%s5133_s19 + $0xd0] sm:$0xff] }
 0x35f   : > { %4425 = vmatmul.mubr.msk.f32.gmra.mrb[50].mxu0 %vm1435_vm4, %v2857_v33  ;;  %v2859_v58 = vmax.f32 %v2827_v37, 0.0  ;;  %v4862_v33 = vld [vmem:[%s5133_s19 + $0xe0] sm:$0xff]  ;;  %v4863_v37 = vld [vmem:[%s5133_s19 + $0xe8] sm:$0xff]  ;;  %v4864_v42 = vld [vmem:[%s5133_s19 + $0xf0] sm:$0xff] }
 0x360   : > { %v2858_v51 = vmax.f32 %v2826_v44, 0.0  ;;  %v4376_v24 = vpop.f32.mrb[22].mxu1  ;;  %v4865_v44 = vld [vmem:[%s5133_s19 + $0xf8] sm:$0xff] }
 0x361   : > { %v2829_v0 = vadd.f32 %v4376_v24, %v6083_v47  ;;  %v2718_v4 = vpop.f32.mrb[23].mxu1  ;;  %v3821_v24 = vld [vmem:[%s6364_s8] ss:$0 sm:$0xff] }
 0x362   : > { %v2828_v5 = vadd.f32 %v6083_v47, %v2718_v4  ;;  %4427 = vmatprep.mubr.msk.f32.mxu0 %vm1435_vm4, %v2858_v51  ;;  %v3788_v51 = vld [vmem:[%s6362_s6] ss:$0 sm:$0xff] }
 0x363   : > { %4428 = vmatmul.mubr.msk.f32.gmra.mrb[52].mxu0 %vm1435_vm4, %v2859_v58  ;;  %v2861_v61 = vmax.f32 %v2829_v0, 0.0  ;;  %v6237_v4 = vadd.f32 %v3821_v24, %v3788_v51 }
 0x364   : > { %v2860_v7 = vmax.f32 %v2828_v5, 0.0  ;;  %v4379_v23 = vpop.f32.mrb[24].mxu1 }
 0x365   : > { %v2831_v8 = vadd.f32 %v4379_v23, %v6083_v47  ;;  %v2728_v13 = vpop.f32.mrb[25].mxu1 }
 0x366   : > { %v2830_v15 = vadd.f32 %v6083_v47, %v2728_v13  ;;  %4430 = vmatprep.mubr.msk.f32.mxu0 %vm1435_vm4, %v2860_v7 }
 0x367   : > { %4431 = vmatmul.mubr.msk.f32.gmra.mrb[54].mxu0 %vm1435_vm4, %v2861_v61  ;;  %v2863_v18 = vmax.f32 %v2831_v8, 0.0 }
 0x368   : > { %v2862_v16 = vmax.f32 %v2830_v15, 0.0  ;;  %v4382_v34 = vpop.f32.mrb[26].mxu1 }
 0x369   : > { %v2833_v62 = vadd.f32 %v4382_v34, %v6083_v47  ;;  %v2738_v46 = vpop.f32.mrb[27].mxu1 }
 0x36a   : > { %v2832_v19 = vadd.f32 %v6083_v47, %v2738_v46  ;;  %4433 = vmatprep.mubr.msk.f32.mxu0 %vm1435_vm4, %v2862_v16 }
 0x36b   : > { %4434 = vmatmul.mubr.msk.f32.gmra.mrb[56].mxu0 %vm1435_vm4, %v2863_v18  ;;  %v2865_v9 = vmax.f32 %v2833_v62, 0.0 }
 0x36c   : > { %v2864_v10 = vmax.f32 %v2832_v19, 0.0  ;;  %v4385_v20 = vpop.f32.mrb[28].mxu1 }
 0x36d   : > { %v2835_v25 = vadd.f32 %v4385_v20, %v6083_v47  ;;  %v2748_v12 = vpop.f32.mrb[29].mxu1 }
 0x36e   : > { %v2834_v26 = vadd.f32 %v6083_v47, %v2748_v12  ;;  %4436 = vmatprep.mubr.msk.f32.mxu0 %vm1435_vm4, %v2864_v10 }
 0x36f   : > { %4437 = vmatmul.mubr.msk.f32.gmra.mrb[58].mxu0 %vm1435_vm4, %v2865_v9  ;;  %v2867_v52 = vmax.f32 %v2835_v25, 0.0 }
 0x370   : > { %v2866_v27 = vmax.f32 %v2834_v26, 0.0  ;;  %v4388_v29 = vpop.f32.mrb[30].mxu1 }
 0x371   : > { %v2837_v31 = vadd.f32 %v4388_v29, %v6083_v47  ;;  %v2758_v32 = vpop.f32.mrb[31].mxu1 }
 0x372   : > { %v2836_v36 = vadd.f32 %v6083_v47, %v2758_v32  ;;  %4439 = vmatprep.mubr.msk.f32.mxu0 %vm1435_vm4, %v2866_v27  ;;  %v4836_v47 = vld [vmem:[%s5133_s19 + $0x10] sm:$0xff]  ;;  %s6407_s19 = sshll.u32 %s5127_s29, 8 }
 0x373   : > { %4440 = vmatmul.mubr.msk.f32.gmra.mrb[60].mxu0 %vm1435_vm4, %v2867_v52  ;;  %v2869_v39 = vmax.f32 %v2837_v31, 0.0  ;;  %s6243_s23 = scalar_lea.vmem [#allocation6], %s6407_s19 }
 0x374   : > { %v2868_v38 = vmax.f32 %v2836_v36, 0.0  ;;  %s3552_s17 = sshll.u32 %s6243_s23, 4  ;;  %s6310_s17 = int_to_ptr.vmem [resolvable:$true] %s3552_s17 }
 0x375   : > { %s4896_s20 = scalar_lea.vmem %s6310_s17, 4096  ;;  %p4903_p8 = scmp.lt.s32.totalorder %s6310_s17, %s4901_s28 }
 0x376   : > { %4442 = vmatprep.mubr.msk.f32.mxu0 %vm1435_vm4, %v2868_v38  ;;  %p4897_p6 = scmp.ne.s32.totalorder %s6310_s17, %s4896_s20  ;;  %p4904_p10 = scmp.lt.s32.totalorder %s4902_s14, %s4896_s20 }
 0x377   : > { %4443 = vmatmul.mubr.msk.f32.gmra.mrb[62].mxu0 %vm1435_vm4, %v2869_v39 }
 0x378   : > { %4461 = vmatprep.mubr.msk.f32.mxu0 %vm400_vm0, %v4834_v40  ;;  %p4898_p12 = pnand %p4897_p6, %p6408_p11  ;;  %p4905_p0 = por %p4904_p10, %p4903_p8 }
 0x37a   : > { %p4899_p13 = pneg %p4898_p12 }
 0x37b   : > { %4462 = vmatmul.mubr.msk.f32.vlgmr.msra.gmra.mrb[32].mxu0 %vm400_vm0, %v4835_v43 }
 0x37c   : > { %4464 = vmatprep.mubr.msk.f32.mxu0 %vm400_vm0, %v4836_v47  ;;  %p4906_p2 = pnand %p4905_p0, %p4899_p13 }
 0x37f   : > { %4465 = vmatmul.mubr.msk.f32.gmra.mrb[34].mxu0 %vm400_vm0, %v4837_v45 }
 0x380   : > { %4467 = vmatprep.mubr.msk.f32.mxu0 %vm400_vm0, %v4838_v49 }
 0x383   : > { %4468 = vmatmul.mubr.msk.f32.gmra.mrb[36].mxu0 %vm400_vm0, %v4839_v50 }
 0x384   : > { %4470 = vmatprep.mubr.msk.f32.mxu0 %vm400_vm0, %v4840_v53 }
 0x387   : > { %4471 = vmatmul.mubr.msk.f32.gmra.mrb[38].mxu0 %vm400_vm0, %v4841_v54 }
 0x388   : > { %4473 = vmatprep.mubr.msk.f32.mxu0 %vm400_vm0, %v4842_v48 }
 0x38b   : > { %4474 = vmatmul.mubr.msk.f32.gmra.mrb[40].mxu0 %vm400_vm0, %v4843_v56 }
 0x38c   : > { %4476 = vmatprep.mubr.msk.f32.mxu0 %vm400_vm0, %v4844_v41 }
 0x38f   : > { %4477 = vmatmul.mubr.msk.f32.gmra.mrb[42].mxu0 %vm400_vm0, %v4845_v14 }
 0x390   : > { %4479 = vmatprep.mubr.msk.f32.mxu0 %vm400_vm0, %v4846_v63 }
 0x393   : > { %4480 = vmatmul.mubr.msk.f32.gmra.mrb[44].mxu0 %vm400_vm0, %v4847_v11 }
 0x394   : > { %4482 = vmatprep.mubr.msk.f32.mxu0 %vm400_vm0, %v4848_v1 }
 0x397   : > { %4483 = vmatmul.mubr.msk.f32.gmra.mrb[46].mxu0 %vm400_vm0, %v4849_v2 }
 0x398   : > { %4485 = vmatprep.mubr.msk.f32.mxu0 %vm400_vm0, %v4850_v3 }
 0x39b   : > { %4486 = vmatmul.mubr.msk.f32.gmra.mrb[48].mxu0 %vm400_vm0, %v4851_v55 }
 0x39c   : > { %4488 = vmatprep.mubr.msk.f32.mxu0 %vm400_vm0, %v4852_v57 }
 0x39f   : > { %4489 = vmatmul.mubr.msk.f32.gmra.mrb[50].mxu0 %vm400_vm0, %v4853_v6 }
 0x3a0   : > { %4491 = vmatprep.mubr.msk.f32.mxu0 %vm400_vm0, %v4854_v35 }
 0x3a3   : > { %4492 = vmatmul.mubr.msk.f32.gmra.mrb[52].mxu0 %vm400_vm0, %v4855_v17 }
 0x3a4   : > { %4494 = vmatprep.mubr.msk.f32.mxu0 %vm400_vm0, %v4856_v60 }
 0x3a7   : > { %4495 = vmatmul.mubr.msk.f32.gmra.mrb[54].mxu0 %vm400_vm0, %v4857_v59 }
 0x3a8   : > { %4497 = vmatprep.mubr.msk.f32.mxu0 %vm400_vm0, %v4858_v22 }
 0x3ab   : > { %4498 = vmatmul.mubr.msk.f32.gmra.mrb[56].mxu0 %vm400_vm0, %v4859_v21 }
 0x3ac   : > { %4500 = vmatprep.mubr.msk.f32.mxu0 %vm400_vm0, %v4860_v28 }
 0x3af   : > { %4501 = vmatmul.mubr.msk.f32.gmra.mrb[58].mxu0 %vm400_vm0, %v4861_v30 }
 0x3b0   : > { %4503 = vmatprep.mubr.msk.f32.mxu0 %vm400_vm0, %v4862_v33 }
 0x3b3   : > { %4504 = vmatmul.mubr.msk.f32.gmra.mrb[60].mxu0 %vm400_vm0, %v4863_v37 }
 0x3b4   : > { %4506 = vmatprep.mubr.msk.f32.mxu0 %vm400_vm0, %v4864_v42 }
 0x3b7   : > { %4507 = vmatmul.mubr.msk.f32.gmra.mrb[62].mxu0 %vm400_vm0, %v4865_v44 }
 0x44e   : > { %v4463_v58 = vpop.f32.mrb[32].mxu0 }
 0x44f   : > { %v4621_v0 = vadd.f32 %v4463_v58, %v3788_v51  ;;  %v3283_v5 = vpop.f32.mrb[33].mxu0 }
 0x450   : > { %v4623_v7 = vadd.f32 %v3788_v51, %v3283_v5 }
 0x451   : > { %v4622_v23 = vadd.f32 %v4621_v0, %v3821_v24 }
 0x452   : > { %v4624_v61 = vadd.f32 %v4623_v7, %v3821_v24  ;;  %v4466_v8 = vpop.f32.mrb[34].mxu0 }
 0x453   : > { %v3475_v13 = vmax.f32 %v4622_v23, 0.0  ;;  %v4626_v15 = vadd.f32 %v6237_v4, %v4466_v8  ;;  %v3293_v16 = vpop.f32.mrb[35].mxu0 }
 0x454   : > { %v3474_v34 = vmax.f32 %v4624_v61, 0.0  ;;  %v4628_v18 = vadd.f32 %v6237_v4, %v3293_v16 }
 0x455   : > { %3507 = vst [vmem:[%s6243_s23 + $0x8] sm:$0xff] %v3475_v13  ;;  %v3477_v62 = vmax.f32 %v4626_v15, 0.0 }
 0x456   : > { %3506 = vst [vmem:[%s6243_s23] sm:$0xff] %v3474_v34  ;;  %v3476_v46 = vmax.f32 %v4628_v18, 0.0  ;;  %v4469_v19 = vpop.f32.mrb[36].mxu0 }
 0x457   : > { %3509 = vst [vmem:[%s6243_s23 + $0x18] sm:$0xff] %v3477_v62  ;;  %v4630_v10 = vadd.f32 %v6237_v4, %v4469_v19  ;;  %v3303_v20 = vpop.f32.mrb[37].mxu0 }
 0x458   : > { %3508 = vst [vmem:[%s6243_s23 + $0x10] sm:$0xff] %v3476_v46  ;;  %v4632_v9 = vadd.f32 %v6237_v4, %v3303_v20 }
 0x459   : > { %v3479_v25 = vmax.f32 %v4630_v10, 0.0 }
 0x45a   : > { %v3478_v12 = vmax.f32 %v4632_v9, 0.0  ;;  %v4472_v26 = vpop.f32.mrb[38].mxu0 }
 0x45b   : > { %3511 = vst [vmem:[%s6243_s23 + $0x28] sm:$0xff] %v3479_v25  ;;  %v4634_v27 = vadd.f32 %v6237_v4, %v4472_v26  ;;  %v3313_v29 = vpop.f32.mrb[39].mxu0 }
 0x45c   : > { %3510 = vst [vmem:[%s6243_s23 + $0x20] sm:$0xff] %v3478_v12  ;;  %v4636_v52 = vadd.f32 %v6237_v4, %v3313_v29 }
 0x45d   : > { %v3481_v31 = vmax.f32 %v4634_v27, 0.0 }
 0x45e   : > { %v3480_v32 = vmax.f32 %v4636_v52, 0.0  ;;  %v4475_v36 = vpop.f32.mrb[40].mxu0 }
 0x45f   : > { %3513 = vst [vmem:[%s6243_s23 + $0x38] sm:$0xff] %v3481_v31  ;;  %v4638_v38 = vadd.f32 %v6237_v4, %v4475_v36  ;;  %v3323_v39 = vpop.f32.mrb[41].mxu0 }
 0x460   : > { %3512 = vst [vmem:[%s6243_s23 + $0x30] sm:$0xff] %v3480_v32  ;;  %v4640_v40 = vadd.f32 %v6237_v4, %v3323_v39 }
 0x461   : > { %v3483_v43 = vmax.f32 %v4638_v38, 0.0 }
 0x462   : > { %v3482_v47 = vmax.f32 %v4640_v40, 0.0  ;;  %v4478_v45 = vpop.f32.mrb[42].mxu0 }
 0x463   : > { %3515 = vst [vmem:[%s6243_s23 + $0x48] sm:$0xff] %v3483_v43  ;;  %v4642_v49 = vadd.f32 %v6237_v4, %v4478_v45  ;;  %v3333_v50 = vpop.f32.mrb[43].mxu0 }
 0x464   : > { %3514 = vst [vmem:[%s6243_s23 + $0x40] sm:$0xff] %v3482_v47  ;;  %v4644_v53 = vadd.f32 %v6237_v4, %v3333_v50 }
 0x465   : > { %v3485_v54 = vmax.f32 %v4642_v49, 0.0 }
 0x466   : > { %v3484_v48 = vmax.f32 %v4644_v53, 0.0  ;;  %v4481_v56 = vpop.f32.mrb[44].mxu0 }
 0x467   : > { %3517 = vst [vmem:[%s6243_s23 + $0x58] sm:$0xff] %v3485_v54  ;;  %v4646_v41 = vadd.f32 %v6237_v4, %v4481_v56  ;;  %v3343_v14 = vpop.f32.mrb[45].mxu0 }
 0x468   : > { %3516 = vst [vmem:[%s6243_s23 + $0x50] sm:$0xff] %v3484_v48  ;;  %v4648_v63 = vadd.f32 %v6237_v4, %v3343_v14 }
 0x469   : > { %v3487_v11 = vmax.f32 %v4646_v41, 0.0 }
 0x46a   : > { %v3486_v1 = vmax.f32 %v4648_v63, 0.0  ;;  %v4484_v2 = vpop.f32.mrb[46].mxu0 }
 0x46b   : > { %3519 = vst [vmem:[%s6243_s23 + $0x68] sm:$0xff] %v3487_v11  ;;  %v4650_v3 = vadd.f32 %v6237_v4, %v4484_v2  ;;  %v3353_v55 = vpop.f32.mrb[47].mxu0 }
 0x46c   : > { %3518 = vst [vmem:[%s6243_s23 + $0x60] sm:$0xff] %v3486_v1  ;;  %v4652_v57 = vadd.f32 %v6237_v4, %v3353_v55 }
 0x46d   : > { %v3489_v6 = vmax.f32 %v4650_v3, 0.0 }
 0x46e   : > { %v3488_v35 = vmax.f32 %v4652_v57, 0.0  ;;  %v4487_v17 = vpop.f32.mrb[48].mxu0 }
 0x46f   : > { %3521 = vst [vmem:[%s6243_s23 + $0x78] sm:$0xff] %v3489_v6  ;;  %v4654_v60 = vadd.f32 %v6237_v4, %v4487_v17  ;;  %v3363_v59 = vpop.f32.mrb[49].mxu0 }
 0x470   : > { %3520 = vst [vmem:[%s6243_s23 + $0x70] sm:$0xff] %v3488_v35  ;;  %v4656_v22 = vadd.f32 %v6237_v4, %v3363_v59 }
 0x471   : > { %v3491_v21 = vmax.f32 %v4654_v60, 0.0 }
 0x472   : > { %v3490_v28 = vmax.f32 %v4656_v22, 0.0  ;;  %v4490_v30 = vpop.f32.mrb[50].mxu0 }
 0x473   : > { %3523 = vst [vmem:[%s6243_s23 + $0x88] sm:$0xff] %v3491_v21  ;;  %v4658_v33 = vadd.f32 %v6237_v4, %v4490_v30  ;;  %v3373_v37 = vpop.f32.mrb[51].mxu0 }
 0x474   : > { %3522 = vst [vmem:[%s6243_s23 + $0x80] sm:$0xff] %v3490_v28  ;;  %v4660_v42 = vadd.f32 %v6237_v4, %v3373_v37 }
 0x475   : > { %v3493_v44 = vmax.f32 %v4658_v33, 0.0 }
 0x476   : > { %v3492_v51 = vmax.f32 %v4660_v42, 0.0  ;;  %v4493_v24 = vpop.f32.mrb[52].mxu0 }
 0x477   : > { %3525 = vst [vmem:[%s6243_s23 + $0x98] sm:$0xff] %v3493_v44  ;;  %v4662_v58 = vadd.f32 %v6237_v4, %v4493_v24  ;;  %v3383_v0 = vpop.f32.mrb[53].mxu0 }
 0x478   : > { %3524 = vst [vmem:[%s6243_s23 + $0x90] sm:$0xff] %v3492_v51  ;;  %v4664_v5 = vadd.f32 %v6237_v4, %v3383_v0 }
 0x479   : > { %v3495_v7 = vmax.f32 %v4662_v58, 0.0 }
 0x47a   : > { %v3494_v23 = vmax.f32 %v4664_v5, 0.0  ;;  %v4496_v61 = vpop.f32.mrb[54].mxu0 }
 0x47b   : > { %3527 = vst [vmem:[%s6243_s23 + $0xa8] sm:$0xff] %v3495_v7  ;;  %v4666_v8 = vadd.f32 %v6237_v4, %v4496_v61  ;;  %v3393_v13 = vpop.f32.mrb[55].mxu0 }
 0x47c   : > { %3526 = vst [vmem:[%s6243_s23 + $0xa0] sm:$0xff] %v3494_v23  ;;  %v4668_v15 = vadd.f32 %v6237_v4, %v3393_v13 }
 0x47d   : > { %v3497_v16 = vmax.f32 %v4666_v8, 0.0 }
 0x47e   : > { %v3496_v34 = vmax.f32 %v4668_v15, 0.0  ;;  %v4499_v18 = vpop.f32.mrb[56].mxu0 }
 0x47f   : > { %3529 = vst [vmem:[%s6243_s23 + $0xb8] sm:$0xff] %v3497_v16  ;;  %v4670_v62 = vadd.f32 %v6237_v4, %v4499_v18  ;;  %v3403_v46 = vpop.f32.mrb[57].mxu0 }
 0x480   : > { %3528 = vst [vmem:[%s6243_s23 + $0xb0] sm:$0xff] %v3496_v34  ;;  %v4672_v19 = vadd.f32 %v6237_v4, %v3403_v46 }
 0x481   : > { %v3499_v10 = vmax.f32 %v4670_v62, 0.0 }
 0x482   : > { %v3498_v20 = vmax.f32 %v4672_v19, 0.0  ;;  %v4502_v9 = vpop.f32.mrb[58].mxu0 }
 0x483   : > { %3531 = vst [vmem:[%s6243_s23 + $0xc8] sm:$0xff] %v3499_v10  ;;  %v4674_v25 = vadd.f32 %v6237_v4, %v4502_v9  ;;  %v3413_v12 = vpop.f32.mrb[59].mxu0 }
 0x484   : > { %3530 = vst [vmem:[%s6243_s23 + $0xc0] sm:$0xff] %v3498_v20  ;;  %v4676_v26 = vadd.f32 %v6237_v4, %v3413_v12 }
 0x485   : > { %v3501_v27 = vmax.f32 %v4674_v25, 0.0 }
 0x486   : > { %v3500_v29 = vmax.f32 %v4676_v26, 0.0  ;;  %v4505_v52 = vpop.f32.mrb[60].mxu0 }
 0x487   : > { %3533 = vst [vmem:[%s6243_s23 + $0xd8] sm:$0xff] %v3501_v27  ;;  %v4678_v31 = vadd.f32 %v6237_v4, %v4505_v52  ;;  %v3423_v32 = vpop.f32.mrb[61].mxu0 }
 0x488   : > { %3532 = vst [vmem:[%s6243_s23 + $0xd0] sm:$0xff] %v3500_v29  ;;  %v4680_v36 = vadd.f32 %v6237_v4, %v3423_v32 }
 0x489   : > { %v3503_v38 = vmax.f32 %v4678_v31, 0.0 }
 0x48a   : > { %v3502_v39 = vmax.f32 %v4680_v36, 0.0  ;;  %v4508_v40 = vpop.f32.mrb[62].mxu0 }
 0x48b   : > { %3535 = vst [vmem:[%s6243_s23 + $0xe8] sm:$0xff] %v3503_v38  ;;  %v4682_v43 = vadd.f32 %v6237_v4, %v4508_v40  ;;  %v3433_v47 = vpop.f32.mrb[63].mxu0 }
 0x48c   : > { %3534 = vst [vmem:[%s6243_s23 + $0xe0] sm:$0xff] %v3502_v39  ;;  %v4684_v45 = vadd.f32 %v6237_v4, %v3433_v47 }
 0x48d   : > { %v3505_v49 = vmax.f32 %v4682_v43, 0.0 }
 0x48e   : > { %v3504_v50 = vmax.f32 %v4684_v45, 0.0 }
 0x48f   : > { %3537 = vst [vmem:[%s6243_s23 + $0xf8] sm:$0xff] %v3505_v49 }
 0x490   : > { %3536 = vst [vmem:[%s6243_s23 + $0xf0] sm:$0xff] %v3504_v50 }
 0x491   : > { %4909 = shalt.err (!%p4906_p2)
}
 0x492   : > { %s4910_s19 = scalar_lea.hbm %s6308_s25, 4096  ;;  %s4914_s27 = scalar_lea.hbm %s6365_s9, 8192 }
 0x493   : > { %p4911_p4 = scmp.ne.s32.totalorder %s6308_s25, %s4910_s19  ;;  %p4915_p9 = scmp.lt.u32.totalorder %s6308_s25, %s6365_s9 }
 0x494   : > { %p4916_p1 = scmp.lt.u32.totalorder %s4914_s27, %s4910_s19  ;;  %p4918_p6 = scmp.lt.u32.totalorder %s4910_s19, %s6308_s25 }
 0x495   : > { %p4912_p5 = pnand %p4911_p4, %p6408_p11 }
 0x496   : > { %p4917_p3 = por %p4916_p1, %p4915_p9 }
 0x497   : > { %p4913_p7 = pneg %p4912_p5 }
 0x498   : > { %p4919_p12 = por %p4918_p6, %p4917_p3 }
 0x49a   : > { %p4920_p13 = pnand %p4919_p12, %p4913_p7 }
 0x49c   : > { %4923 = shalt.err (!%p4920_p13)
}
 0x49d   : > { %s4971_s20 = smov 128   ;;  %s4972_s28 = smov 8  }
 0x49e   : > { %4783 = dma.vmem_to_hbm [thread:$0]  (%p6408_p11), %s6310_s17, 4096, %s6308_s25, %s3539_s13, %s4971_s20, %s4971_s20, %s4972_s28  }
 0x49f PF: > { %s3567_s14 = sand.u32 1, %s4950_s30   ;;  %p6409_p8 = scmp.ne.s32.totalorder %s6371_s22, 0 }
 0x4a0   : > { %p6410_p10 = scmp.ge.s32.totalorder %s4962_s12, 2  ;;  %s3568_s19 = scalar_lea.sflag [#allocation5], %s3567_s14 }
 0x4a2   : > { %p4790_p0 = pnand %p6410_p10, %p6409_p8 }
 0x4a4   : > { %4945 = dma.done.wait (!%p4790_p0), %s3568_s19, 4096  }
 0x4a5   : > { %4947 = vsyncadd (!%p4790_p0), %s3568_s19, 4294963200  ;;  %p22_p2 = scmp.ge.s32.totalorder %s5048_s15, 4   ;;  %s6411_s30 = smov %s4954_s10 }
 0x4a6   : > { %s6412_s10 = smov %s4958_s11  ;;  %s6413_s11 = smov %s5060_s18 }
 0x4a7   : > { %s6414_s12 = smov %s5048_s15  ;;  %24 = sbr.rel (!%p22_p2) target bundleno = 5 (0x5), region = 103 }
 0x4ae   :  { %3573 = vsyncpa [#allocation4], 1 }
 0x4af   :  { %3575 = vsyncpa [#allocation4 + $0x1], 1 }
 0x4b0   :  { %3576 = vsyncpa [#allocation5], 1 }
 0x4b1   :  { %3578 = vsyncpa [#allocation5 + $0x1], 1 }

</bundles_post_ra>
